<compile_context>
chip_gen: v7x
topology: tpu7x:2x2x1
jax: 0.10.0
libtpu: 0.0.40
codegen_flags: <defaults>
</compile_context>

<pallas_src>
import functools
import math

import numpy as np
import jax
import jax.numpy as jnp
from jax import lax
from jax.experimental import pallas as pl
from jax.experimental.pallas import tpu as pltpu


# --------------------------------------------------------------------------- #
# helpers
# --------------------------------------------------------------------------- #
def _tile(n, cap, align=8):
    """Largest divisor of n that is <= cap and a multiple of `align`;
    falls back to the full dimension (always a legal Mosaic block)."""
    cap = max(1, min(cap, n))
    for t in range(cap, 0, -1):
        if n % t == 0 and t % align == 0:
            return t
    return n


def _rmsnorm(x, scale):
    # matches torch RMSNorm: f32 mean-square, rsqrt(+1e-6), then * scale
    rrms = lax.rsqrt(jnp.mean(x * x, axis=-1, keepdims=True) + 1e-6)
    return (x * rrms) * scale


# --------------------------------------------------------------------------- #
# tiled linear (matmul [+ bias]) kernels
# --------------------------------------------------------------------------- #
def _matmul_kernel(x_ref, w_ref, o_ref, acc_ref):
    @pl.when(pl.program_id(2) == 0)
    def _():
        acc_ref[...] = jnp.zeros_like(acc_ref)

    acc_ref[...] += jnp.dot(x_ref[...], w_ref[...],
                            preferred_element_type=jnp.float32)

    @pl.when(pl.program_id(2) == pl.num_programs(2) - 1)
    def _():
        o_ref[...] = acc_ref[...].astype(o_ref.dtype)


def _matmul_bias_kernel(x_ref, w_ref, b_ref, o_ref, acc_ref):
    @pl.when(pl.program_id(2) == 0)
    def _():
        acc_ref[...] = jnp.zeros_like(acc_ref)

    acc_ref[...] += jnp.dot(x_ref[...], w_ref[...],
                            preferred_element_type=jnp.float32)

    @pl.when(pl.program_id(2) == pl.num_programs(2) - 1)
    def _():
        o_ref[...] = (acc_ref[...] + b_ref[...].astype(jnp.float32)).astype(o_ref.dtype)


def linear(x2d, w, b=None, *, tm=512, tn=512, tk=1024):
    """y = x2d @ w (+ b).  w laid out (in, out).  K-reduction innermost,
    f32 VMEM accumulator, bf16 (input-dtype) MXU operands."""
    M, K = x2d.shape
    Kw, N = w.shape
    assert K == Kw
    tm = _tile(M, tm, align=8)
    tn = _tile(N, tn, align=128)
    tk = _tile(K, tk, align=128)
    grid = (M // tm, N // tn, K // tk)

    x_spec = pl.BlockSpec((tm, tk), lambda i, j, k: (i, k))
    w_spec = pl.BlockSpec((tk, tn), lambda i, j, k: (k, j))
    o_spec = pl.BlockSpec((tm, tn), lambda i, j, k: (i, j))
    scratch = [pltpu.VMEM((tm, tn), jnp.float32)]
    cparams = pltpu.CompilerParams(
        dimension_semantics=("parallel", "parallel", "arbitrary"))
    out_shape = jax.ShapeDtypeStruct((M, N), x2d.dtype)

    if b is None:  # qkv_bias=False path: skip the bias add entirely
        return pl.pallas_call(
            _matmul_kernel, out_shape=out_shape, grid=grid,
            in_specs=[x_spec, w_spec], out_specs=o_spec,
            scratch_shapes=scratch, compiler_params=cparams,
        )(x2d, w)

    b_spec = pl.BlockSpec((1, tn), lambda i, j, k: (0, j))
    return pl.pallas_call(
        _matmul_bias_kernel, out_shape=out_shape, grid=grid,
        in_specs=[x_spec, w_spec, b_spec], out_specs=o_spec,
        scratch_shapes=scratch, compiler_params=cparams,
    )(x2d, w, b.reshape(1, N))


# --------------------------------------------------------------------------- #
# prepass: RMSNorm + RoPE on Q and K (once per element, bf16 out)
# --------------------------------------------------------------------------- #
def _qk_norm_rope_kernel(q_ref, k_ref, pa_ref, pb_ref, qs_ref, ks_ref,
                         qo_ref, ko_ref, *, scale, half):
    pa = pa_ref[0]                       # (tl, Dh) f32
    pb = pb_ref[0]

    def norm_rope(x, s):
        xn = _rmsnorm(x.astype(jnp.float32), s.astype(jnp.float32))
        # De-interleaved RoPE: rotation partner of lane d is lane (d +- Dh/2).
        xs = jnp.concatenate([xn[:, half:], xn[:, :half]], axis=1)
        return pa * xn + pb * xs

    # Q: fold 1/sqrt(Dh) in here so the flash kernel never rescales.
    qo_ref[0] = (norm_rope(q_ref[0], qs_ref[...]) * scale).astype(qo_ref.dtype)
    ko_ref[0] = norm_rope(k_ref[0], ks_ref[...]).astype(ko_ref.dtype)


# --------------------------------------------------------------------------- #
# flash attention (online softmax; inner loop = two bf16 matmuls)
# --------------------------------------------------------------------------- #
def _flash_attn_kernel(q_ref, k_ref, v_ref, o_ref, m_sc, l_sc, acc_sc):
    ki = pl.program_id(3)

    @pl.when(ki == 0)
    def _():
        m_sc[...] = jnp.full(m_sc.shape, -jnp.inf, jnp.float32)
        l_sc[...] = jnp.zeros_like(l_sc)
        acc_sc[...] = jnp.zeros_like(acc_sc)

    # scores (tq, tkv): contract Dh with Dh (NT), bf16 operands, f32 acc.
    s = lax.dot_general(q_ref[0], k_ref[0], (((1,), (1,)), ((), ())),
                        preferred_element_type=jnp.float32)

    # online softmax update
    m_new = jnp.maximum(m_sc[...], jnp.max(s, axis=-1, keepdims=True))
    alpha = jnp.exp(m_sc[...] - m_new)
    p = jnp.exp(s - m_new)
    l_sc[...] = alpha * l_sc[...] + jnp.sum(p, axis=-1, keepdims=True)
    acc_sc[...] = alpha * acc_sc[...] + jnp.dot(
        p.astype(v_ref.dtype), v_ref[0], preferred_element_type=jnp.float32)
    m_sc[...] = m_new

    @pl.when(ki == pl.num_programs(3) - 1)
    def _():
        o_ref[0] = (acc_sc[...] / l_sc[...]).astype(o_ref.dtype)


# --------------------------------------------------------------------------- #
# module wrapper
# --------------------------------------------------------------------------- #
def self_attention(x, pe, params, num_heads, *, tq=512, tkv=256,
                   compute_dtype=jnp.bfloat16):
    B, L, D = x.shape
    H = num_heads
    Dh = D // H
    half = Dh // 2

    # ---- offline parameter prep (one-time, would happen at weight-load) ------
    # De-interleave RoPE: within each Q/K head reorder columns to
    # [even dims..., odd dims...].  Q.K is invariant to this shared permutation;
    # V columns and the output layout are untouched.
    perm = np.concatenate([np.arange(0, Dh, 2), np.arange(1, Dh, 2)])
    col_perm = np.arange(3 * D)
    for h in range(H):
        col_perm[h * Dh:(h + 1) * Dh] = h * Dh + perm                # Q head h
        col_perm[D + h * Dh:D + (h + 1) * Dh] = D + h * Dh + perm    # K head h
    w_qkv = params["w_qkv"][:, col_perm].astype(compute_dtype)
    w_proj = params["w_proj"].astype(compute_dtype)
    b_proj = params["b_proj"].reshape(1, D).astype(jnp.float32)
    q_scale = params["q_scale"][perm].reshape(1, Dh).astype(jnp.float32)
    k_scale = params["k_scale"][perm].reshape(1, Dh).astype(jnp.float32)

    # pe (1, 1, L, Dh//2, 2, 2) -> de-interleaved per-position coefficients
    # (1, L, Dh):  out = pa * x + pb * swap_halves(x)
    pe_ = pe.reshape(L, Dh // 2, 2, 2).astype(jnp.float32)
    pa = jnp.concatenate([pe_[:, :, 0, 0], pe_[:, :, 1, 1]], axis=-1).reshape(1, L, Dh)
    pb = jnp.concatenate([pe_[:, :, 0, 1], pe_[:, :, 1, 0]], axis=-1).reshape(1, L, Dh)

    # ---- qkv projection (no bias: qkv_bias=False), bf16 MXU / f32 acc --------
    qkv = linear(x.reshape(B * L, D).astype(compute_dtype), w_qkv, None)
    qkv = qkv.reshape(B, L, 3 * D)

    # ---- prepass: RMSNorm + RoPE on Q and K, once per position ---------------
    tl = _tile(L, 512, align=8)
    prep = functools.partial(_qk_norm_rope_kernel,
                             scale=1.0 / math.sqrt(Dh), half=half)
    qr, kr = pl.pallas_call(
        prep,
        out_shape=(jax.ShapeDtypeStruct((B, L, D), compute_dtype),
                   jax.ShapeDtypeStruct((B, L, D), compute_dtype)),
        grid=(B, H, L // tl),
        in_specs=[
            pl.BlockSpec((1, tl, Dh), lambda b, h, li: (b, li, h)),        # q slice
            pl.BlockSpec((1, tl, Dh), lambda b, h, li: (b, li, H + h)),    # k slice
            pl.BlockSpec((1, tl, Dh), lambda b, h, li: (0, li, 0)),        # pa
            pl.BlockSpec((1, tl, Dh), lambda b, h, li: (0, li, 0)),        # pb
            pl.BlockSpec((1, Dh), lambda b, h, li: (0, 0)),                # query_norm.scale
            pl.BlockSpec((1, Dh), lambda b, h, li: (0, 0)),                # key_norm.scale
        ],
        out_specs=(pl.BlockSpec((1, tl, Dh), lambda b, h, li: (b, li, h)),
                   pl.BlockSpec((1, tl, Dh), lambda b, h, li: (b, li, h))),
        compiler_params=pltpu.CompilerParams(
            dimension_semantics=("parallel", "parallel", "parallel")),
    )(qkv, qkv, pa, pb, q_scale, k_scale)

    # ---- flash attention ------------------------------------------------------
    tq = _tile(L, tq, align=8)
    tkv = _tile(L, tkv, align=8)
    attn = pl.pallas_call(
        _flash_attn_kernel,
        out_shape=jax.ShapeDtypeStruct((B, L, D), compute_dtype),
        grid=(B, H, L // tq, L // tkv),
        in_specs=[
            pl.BlockSpec((1, tq, Dh), lambda b, h, qi, ki: (b, qi, h)),           # qr (normed+roped+scaled)
            pl.BlockSpec((1, tkv, Dh), lambda b, h, qi, ki: (b, ki, h)),          # kr (normed+roped)
            pl.BlockSpec((1, tkv, Dh), lambda b, h, qi, ki: (b, ki, 2 * H + h)),  # v (raw qkv slice)
        ],
        # Output written directly in merged "B L (H D)" layout, lane-dense Dh.
        out_specs=pl.BlockSpec((1, tq, Dh), lambda b, h, qi, ki: (b, qi, h)),
        scratch_shapes=[
            pltpu.VMEM((tq, 1), jnp.float32),    # m (running max)
            pltpu.VMEM((tq, 1), jnp.float32),    # l (running denom)
            pltpu.VMEM((tq, Dh), jnp.float32),   # acc (running numerator)
        ],
        compiler_params=pltpu.CompilerParams(
            dimension_semantics=("parallel", "parallel", "parallel", "arbitrary")),
    )(qr, kr, qkv)

    # ---- output projection ----------------------------------------------------
    out = linear(attn.reshape(B * L, D), w_proj, b_proj)
    return out.reshape(B, L, D).astype(x.dtype)


# --------------------------------------------------------------------------- #
# pure-JAX reference (for a correctness sanity check)
# --------------------------------------------------------------------------- #
def _reference(x, pe, params, num_heads):
    B, L, D = x.shape
    H = num_heads
    Dh = D // H
    qkv = jnp.einsum("bld,de->ble", x, params["w_qkv"])
    qkv = qkv.reshape(B, L, 3, H, Dh).transpose(2, 0, 3, 1, 4)
    q, k, v = qkv[0], qkv[1], qkv[2]

    def rmsnorm(t, s):
        rrms = lax.rsqrt(jnp.mean(t.astype(jnp.float32) ** 2, -1, keepdims=True) + 1e-6)
        return (t * rrms) * s

    q = rmsnorm(q, params["q_scale"])
    k = rmsnorm(k, params["k_scale"])

    def rope(t):
        t_ = t.reshape(B, H, L, Dh // 2, 1, 2)
        out = pe[..., 0] * t_[..., 0] + pe[..., 1] * t_[..., 1]
        return out.reshape(B, H, L, Dh)

    q, k = rope(q), rope(k)
    s = jnp.einsum("bhqd,bhkd->bhqk", q, k) / math.sqrt(Dh)
    p = jax.nn.softmax(s, axis=-1)
    o = jnp.einsum("bhqk,bhkd->bhqd", p, v)
    o = o.transpose(0, 2, 1, 3).reshape(B, L, D)
    return jnp.einsum("bld,de->ble", o, params["w_proj"]) + params["b_proj"]


# --------------------------------------------------------------------------- #
# main
# --------------------------------------------------------------------------- #
if __name__ == "__main__":
    key = jax.random.PRNGKey(0)
    # small but TPU-tile-friendly shapes (Dh=128 so blocks are lane-dense)
    B, L, H, Dh = 2, 128, 4, 128
    D = H * Dh

    k1, k2, k3, k4, k5, k6 = jax.random.split(key, 6)
    x = jax.random.normal(k1, (B, L, D), dtype=jnp.float32)

    params = {
        # torch Linear is y = x @ W.T + b; weights generated directly as (in, out)
        "w_qkv": 0.05 * jax.random.normal(k2, (D, 3 * D), dtype=jnp.float32),
        "w_proj": 0.05 * jax.random.normal(k3, (D, D), dtype=jnp.float32),
        "b_proj": 0.05 * jax.random.normal(k4, (D,), dtype=jnp.float32),
        # RMSNorm scales (init=ones; perturb slightly to exercise the permuted path)
        "q_scale": 1.0 + 0.05 * jax.random.normal(k5, (Dh,), dtype=jnp.float32),
        "k_scale": 1.0 + 0.05 * jax.random.normal(k6, (Dh,), dtype=jnp.float32),
    }

    # deterministic flux-style rotary pe of shape (1, 1, L, Dh//2, 2, 2)
    pos = jnp.arange(L, dtype=jnp.float32)
    freqs = 1.0 / (10000.0 ** (jnp.arange(0, Dh, 2, dtype=jnp.float32) / Dh))
    ang = pos[:, None] * freqs[None, :]            # (L, Dh//2)
    cos, sin = jnp.cos(ang), jnp.sin(ang)
    pe = jnp.stack(
        [jnp.stack([cos, -sin], axis=-1), jnp.stack([sin, cos], axis=-1)],
        axis=-2,
    ).reshape(1, 1, L, Dh // 2, 2, 2)

    out = self_attention(x, pe, params, num_heads=H)
    jax.block_until_ready(out)
    assert out.shape == (B, L, D)

    ref = _reference(x, pe, params, num_heads=H)
    num = jnp.sqrt(jnp.sum((out.astype(jnp.float32) - ref) ** 2))
    den = jnp.sqrt(jnp.sum(ref ** 2))
    rel = float(num / den)
    assert rel < 5e-2, f"relative error too large: {rel}"

    print("KERNEL_OK")
</pallas_src>

<mosaic_0001>
module attributes {stable_mosaic.version = 11 : i64} {
  func.func @_matmul_kernel(%arg0: i32, %arg1: i32, %arg2: i32, %arg3: memref<256x512xbf16, #tpu.memory_space<vmem>>, %arg4: memref<512x512xbf16, #tpu.memory_space<vmem>>, %arg5: memref<256x512xbf16, #tpu.memory_space<vmem>>, %arg6: memref<256x512xf32, #tpu.memory_space<vmem>>) attributes {dimension_semantics = [#tpu.dimension_semantics<parallel>, #tpu.dimension_semantics<parallel>, #tpu.dimension_semantics<arbitrary>], iteration_bounds = array<i64: 1, 3, 1>, scalar_prefetch = 0 : i64, scratch_operands = 1 : i64, tpu.core_type = #tpu.core_type<tc>, window_params = [{transform_indices = @transform_0, window_bounds = array<i64: 256, 512>}, {transform_indices = @transform_1, window_bounds = array<i64: 512, 512>}, {transform_indices = @transform_2, window_bounds = array<i64: 256, 512>}]} {
    %c0_i32 = arith.constant 0 : i32
    %0 = arith.cmpi eq, %arg2, %c0_i32 : i32
    %1 = arith.extui %0 : i1 to i32
    %c0_i32_0 = arith.constant 0 : i32
    %2 = arith.cmpi ne, %1, %c0_i32_0 : i32
    scf.if %2 {
      %cst_10 = arith.constant 0.000000e+00 : f32
      %12 = vector.broadcast %cst_10 : f32 to vector<256x512xf32>
      %c0_11 = arith.constant 0 : index
      %c0_12 = arith.constant 0 : index
      %13 = vector.load %arg6[%c0_11, %c0_12] : memref<256x512xf32, #tpu.memory_space<vmem>>, vector<256x512xf32>
      tpu.vector_store %arg6[%c0_11, %c0_12], %12 {strides = array<i32>} : memref<256x512xf32, #tpu.memory_space<vmem>>, vector<256x512xf32>,
    } else {
    }
    %c0 = arith.constant 0 : index
    %c0_1 = arith.constant 0 : index
    %3 = vector.load %arg6[%c0, %c0_1] : memref<256x512xf32, #tpu.memory_space<vmem>>, vector<256x512xf32>
    %c0_2 = arith.constant 0 : index
    %c0_3 = arith.constant 0 : index
    %4 = vector.load %arg3[%c0_2, %c0_3] : memref<256x512xbf16, #tpu.memory_space<vmem>>, vector<256x512xbf16>
    %c0_4 = arith.constant 0 : index
    %c0_5 = arith.constant 0 : index
    %5 = vector.load %arg4[%c0_4, %c0_5] : memref<512x512xbf16, #tpu.memory_space<vmem>>, vector<512x512xbf16>
    %cst = arith.constant dense<0.000000e+00> : vector<256x512xf32>
    %6 = tpu.matmul %4, %5, %cst {dimension_numbers = #tpu.dot_dimension_numbers<[1], [0], [0], [1], [0, 0, 1, 1], [], []>} : vector<256x512xbf16>, vector<512x512xbf16>, vector<256x512xf32> -> vector<256x512xf32>
    %7 = arith.addf %3, %6 : vector<256x512xf32>
    %c0_6 = arith.constant 0 : index
    %c0_7 = arith.constant 0 : index
    %8 = vector.load %arg6[%c0_6, %c0_7] : memref<256x512xf32, #tpu.memory_space<vmem>>, vector<256x512xf32>
    tpu.vector_store %arg6[%c0_6, %c0_7], %7 {strides = array<i32>} : memref<256x512xf32, #tpu.memory_space<vmem>>, vector<256x512xf32>,
    %c0_i32_8 = arith.constant 0 : i32
    %9 = arith.cmpi eq, %arg2, %c0_i32_8 : i32
    %10 = arith.extui %9 : i1 to i32
    %c0_i32_9 = arith.constant 0 : i32
    %11 = arith.cmpi ne, %10, %c0_i32_9 : i32
    scf.if %11 {
      %c0_10 = arith.constant 0 : index
      %c0_11 = arith.constant 0 : index
      %12 = vector.load %arg6[%c0_10, %c0_11] : memref<256x512xf32, #tpu.memory_space<vmem>>, vector<256x512xf32>
      %13 = arith.truncf %12 : vector<256x512xf32> to vector<256x512xbf16>
      %c0_12 = arith.constant 0 : index
      %c0_13 = arith.constant 0 : index
      %14 = vector.load %arg5[%c0_12, %c0_13] : memref<256x512xbf16, #tpu.memory_space<vmem>>, vector<256x512xbf16>
      tpu.vector_store %arg5[%c0_12, %c0_13], %13 {strides = array<i32>} : memref<256x512xbf16, #tpu.memory_space<vmem>>, vector<256x512xbf16>,
    } else {
    }
    return
  }
  func.func @transform_0(%arg0: i32, %arg1: i32, %arg2: i32) -> (i32, i32) {
    %c0_i32 = arith.constant 0 : i32
    return %arg0, %arg2 : i32, i32
  }
  func.func @transform_1(%arg0: i32, %arg1: i32, %arg2: i32) -> (i32, i32) {
    %c0_i32 = arith.constant 0 : i32
    return %arg2, %arg1 : i32, i32
  }
  func.func @transform_2(%arg0: i32, %arg1: i32, %arg2: i32) -> (i32, i32) {
    %c0_i32 = arith.constant 0 : i32
    return %arg0, %arg1 : i32, i32
  }
}

</mosaic_0001>

<bundles_post_ra>
// kernel: tpu_custom_call.1
= control target key start
LH: loop header
LB: loop body
LE: loop exit
PB: predicated region body
PF: predicated region fallthrough
CT: control target
= control target key end

     0   :  { %7 = vsyncpa [#allocation4], 0  ;;  %s4783_s0 = inlined_call_operand.hbm [shape: bf16[256,512], index: 0, kind: input, shape index: {}]   ;;  %s4784_s1 = inlined_call_operand.hbm [shape: bf16[512,1536], index: 1, kind: input, shape index: {}]   ;;  %s4785_s2 = inlined_call_operand.hbm [shape: bf16[256,1536], index: 2, kind: output, shape index: {}]  }
   0x1   :  { %8 = vsyncpa [#allocation7], 0 }
   0x2   :  { %10 = vsyncpa [#allocation7 + $0x1], 0 }
   0x3   :  { %11 = vsyncpa [#allocation5], 0 }
   0x4   :  { %13 = vsyncpa [#allocation5 + $0x1], 0  ;;  %s4369_s9 = smov 0   ;;  %s4371_s10 = smov 0  }
   0x5   :  { %s4373_s11 = smov 0   ;;  %s4375_s12 = smov 0  }
   0x6   :  { %s4377_s13 = smov 0   ;;  %s4379_s14 = smov 0  }
   0x7 LB: > { %s3365_s15 = sadd.s32 4294967295, %s4343_s14   ;;  %s3366_s16 = sadd.s32 4294967294, %s4343_s14   ;;  %s4343_s14 = sphi %s4379_s14, %s19_s14   ;;  %s4339_s13 = sphi %s4377_s13, %s4810_s13   ;;  %s4335_s12 = sphi %s4375_s12, %s4809_s12   ;;  %s4331_s11 = sphi %s4373_s11, %s4808_s11   ;;  %s4327_s10 = sphi %s4371_s10, %s4807_s10   ;;  %s4323_s9 = sphi %s4369_s9, %s4806_s9  }
   0x8   : > { %p82_p0 = scmp.ne.s32.totalorder %s4331_s11, %s4327_s10  ;;  %p83_p1 = scmp.eq.s32.totalorder %s4343_s14, 0 }
   0x9   : > { %p88_p2 = scmp.ne.s32.totalorder %s4327_s10, %s4323_s9  ;;  %p4406_p3 = scmp.eq.s32.totalorder %s3365_s15, 0 }
   0xa   : > { %p4410_p4 = por %p83_p1, %p82_p0  ;;  %p114_p5 = scmp.eq.s32.totalorder %s3365_s15, 2 }
   0xb   : > { %s4792_s17 = scalar_select %p4406_p3, 1, 0 }
   0xc   : > { %p4416_p6 = por %p4406_p3, %p88_p2  ;;  %p120_p7 = scmp.eq.s32.totalorder %s3366_s16, 2 }
   0xd   : > { %p4420_p8 = por %p114_p5, %p82_p0  ;;  %p3367_p9 = scmp.ge.s32.totalorder %s4343_s14, 1 }
   0xe   : > { %s4794_s19 = scalar_select %p4416_p6, 1, 0 }
   0xf   : > { %s4795_s20 = scalar_select %p4420_p8, 1, 0 }
  0x10   : > { %p4425_p10 = por %p120_p7, %p88_p2  ;;  %p127_p11 = scmp.lt.s32.totalorder %s4343_s14, 4 }
  0x11   : > { %s4345_s23 = smov [#allocation3]   ;;  %p3853_p0 = scmp.lt.s32.totalorder %s4343_s14, 3 }
  0x12   : > { %s4796_s21 = scalar_select %p4425_p10, 1, 0 }
  0x13   : > { %p4430_p12 = pnand %p3367_p9, %p127_p11  ;;  %s145_s24 = sshll.u32 %s4345_s23, 4  ;;  %s146_s24 = int_to_ptr.vmem [resolvable:$true] %s145_s24 }
  0x14   : > { %p4445_p2 = pnand %p3853_p0, %p4410_p4  ;;  %s34_s27 = sadd.s32 1, %s4339_s13 }
  0x15   : > { %s4797_s22 = scalar_select %p4430_p12, 1, 0 }
  0x16   : > { %p3840_p13 = pneg %p4430_p12  ;;  %s4199_s30 = scalar_lea.hbm %s4783_s0, 8192 }
  0x17   : > { %s4799_s26 = scalar_select %p4445_p2, 1, 0 }
  0x18   : > { %p4439_p1 = pnand %p3840_p13, %p4406_p3  ;;  %p4200_p5 = scmp.ne.s32.totalorder %s4783_s0, %s4199_s30 }
  0x19   : > { %p4206_p4 = scmp.lt.u32.totalorder %s4199_s30, %s4783_s0 }
  0x1a   : > { %p4201_p7 = pneg %p4439_p1 }
  0x1c   : > { %p4202_p9 = pnand %p4201_p7, %p4200_p5 }
  0x1e   : > { %p4203_p11 = pneg %p4202_p9 }
  0x20   : > { %p4208_p13 = pnand %p4206_p4, %p4203_p11 }
  0x22   : > { %4211 = shalt.err (!%p4208_p13)
}
  0x23   : > { %s4212_s7 = scalar_lea.vmem %s146_s24, 8192  ;;  %p4220_p6 = scmp.lt.s32.totalorder %s146_s24, %s146_s24 }
  0x24   : > { %p4213_p0 = scmp.ne.s32.totalorder %s146_s24, %s4212_s7  ;;  %p4221_p3 = scmp.lt.s32.totalorder %s4212_s7, %s4212_s7 }
  0x26   : > { %p4215_p10 = pnand %p4213_p0, %p4201_p7  ;;  %p4222_p12 = por %p4221_p3, %p4220_p6 }
  0x28   : > { %p4216_p8 = pneg %p4215_p10 }
  0x2a   : > { %p4223_p2 = pnand %p4222_p12, %p4216_p8 }
  0x2c   : > { %4226 = shalt.err (!%p4223_p2)
}
  0x2d   : > { %s4346_s8 = smov 256   ;;  %s4347_s15 = smov 16  }
  0x2e   : > { %3843 = dma.hbm_to_vmem [thread:$0]  (!%p4439_p1), %s4783_s0, 8192, %s146_s24, [#allocation4], %s4346_s8, %s4346_s8, %s4347_s15  }
  0x2f   : > { %p36_p10 = scmp.ge.s32.totalorder %s34_s27, 3  ;;  %s75_s23 = sadd.s32 1, %s4331_s11 }
  0x30   : > { %s159_s28 = sand.u32 1, %s4331_s11   ;;  %s3638_s3 = sshll.u32 %s4339_s13, 8 }
  0x31   : > { %s4812_s27 = smov (%p36_p10, %s34_s27), 0  ;;  %s3370_s29 = sshll.u32 %s159_s28, 10 }
  0x32   : > { %s71_s30 = ssub.s32 %s4339_s13, %s4812_s27  ;;  %s4479_s5 = scalar_lea.hbm %s4784_s1, %s3638_s3 }
  0x33   : > { %p73_p3 = scmp.eq.s32.totalorder %s71_s30, 0  ;;  %s163_s24 = scalar_lea.vmem [#allocation6], %s3370_s29 }
  0x34   : > { %s173_s6 = sshll.u32 %s163_s24, 4  ;;  %s4486_s16 = scalar_lea.sflag [#allocation7], %s159_s28  ;;  %s4484_s6 = int_to_ptr.vmem [resolvable:$true] %s173_s6 }
  0x35   : > { %s4482_s7 = scalar_select %p73_p3, %s4331_s11, %s75_s23  }
  0x36   : > { %s4227_s18 = scalar_lea.hbm %s4479_s5, 16384  ;;  %p4800_p8 = scmp.ne.s32.totalorder %s4799_s26, 0 }
  0x37   : > { %p4228_p6 = scmp.ne.s32.totalorder %s4479_s5, %s4227_s18  ;;  %s4232_s25 = scalar_lea.hbm %s4784_s1, 49152 }
  0x38   : > { %p4229_p12 = pneg %p4800_p8  ;;  %p4233_p5 = scmp.lt.u32.totalorder %s4479_s5, %s4784_s1 }
  0x39   : > { %p4234_p7 = scmp.lt.u32.totalorder %s4232_s25, %s4227_s18  ;;  %p4236_p11 = scmp.lt.u32.totalorder %s4227_s18, %s4479_s5 }
  0x3a   : > { %p4230_p1 = pnand %p4229_p12, %p4228_p6 }
  0x3b   : > { %p4235_p9 = por %p4234_p7, %p4233_p5 }
  0x3c   : > { %p4231_p2 = pneg %p4230_p1 }
  0x3d   : > { %p4237_p4 = por %p4236_p11, %p4235_p9 }
  0x3f   : > { %p4238_p13 = pnand %p4237_p4, %p4231_p2 }
  0x41   : > { %4241 = shalt.err (!%p4238_p13)
}
  0x42   : > { %s4242_s23 = scalar_lea.vmem %s4484_s6, 16384  ;;  %s4348_s28 = smov [#allocation6]  }
  0x43   : > { %p4243_p0 = scmp.ne.s32.totalorder %s4484_s6, %s4242_s23  ;;  %s4247_s24 = sshll.u32 %s4348_s28, 4  ;;  %s4248_s24 = int_to_ptr.vmem [resolvable:$false] %s4247_s24 }
  0x44   : > { %s4249_s30 = scalar_lea.vmem %s4248_s24, 32768  ;;  %p4250_p6 = scmp.lt.s32.totalorder %s4484_s6, %s4248_s24 }
  0x45   : > { %p4245_p10 = pnand %p4243_p0, %p4229_p12  ;;  %p4251_p1 = scmp.lt.s32.totalorder %s4249_s30, %s4242_s23 }
  0x47   : > { %p4246_p3 = pneg %p4245_p10  ;;  %p4252_p5 = por %p4251_p1, %p4250_p6 }
  0x49   : > { %p4253_p7 = pnand %p4252_p5, %p4246_p3 }
  0x4b   : > { %4256 = shalt.err (!%p4253_p7)
}
  0x4c   : > { %s4349_s18 = smov 768   ;;  %p4801_p12 = scmp.ne.s32.totalorder %s4797_s22, 0 }
  0x4d   : > { %3847 = dma.hbm_to_vmem [thread:$0]  (!%p4800_p8), %s4479_s5, 16384, %s4484_s6, %s4486_s16, %s4349_s18, %s4346_s8, %s4347_s15  }
  0x4e   : > { %185 = sbr.rel (%p4801_p12) target bundleno = 636 (0x27c), region = 28  ;;  %p4802_p2 = scmp.ne.s32.totalorder (!%p4801_p12), %s4792_s17, 0 }
  0x55   : > { %4310 = dma.done.wait (%p4802_p2), [#allocation4], 8192  }
  0x56   : > { %4312 = vsyncadd (%p4802_p2), [#allocation4], 4294959104  ;;  %s4523_s3 = sand.u32 1, %s4327_s10   ;;  %p4803_p8 = scmp.ne.s32.totalorder %s4794_s19, 0 }
  0x57   : > { %s3375_s26 = sshll.u32 %s4523_s3, 10  ;;  %s192_s25 = scalar_lea.sflag [#allocation7], %s4523_s3 }
  0x58   : > { %s4527_s29 = scalar_lea.vmem [#allocation6], %s3375_s26 }
  0x59   : > { %4314 = dma.done.wait (%p4803_p8), %s192_s25, 16384  }
  0x5a   : > { %4316 = vsyncadd (%p4803_p8), %s192_s25, 4294950912  ;;  %v3911_v0 = vld [vmem:[%s4527_s29 + $0x4] ss:$16 sps:$4 sm:$0xff]   ;;  %v3913_v1 = vld [vmem:[%s4527_s29 + $0xc] ss:$16 sps:$4 sm:$0xff]   ;;  %s3376_s17 = sshll.u32 %s4523_s3, 9 }
  0x5b   : > { %1634 = vmatprep.subr.bf16.mxu0 %v3911_v0  ;;  %v3915_v2 = vld [vmem:[%s4527_s29] ss:$16 sps:$4 sm:$0xff]   ;;  %v3916_v3 = vld [vmem:[%s4527_s29 + $0x8] ss:$16 sps:$4 sm:$0xff]   ;;  %2020 = vmatprep.subr.bf16.mxu1 %v3913_v1  ;;  %v3917_v4 = vld [vmem:[%s4527_s29 + $0x24] ss:$16 sps:$4 sm:$0xff]  }
  0x5c   : > { %1635 = vmatpush1.bf16.msra.mxu0 %v3915_v2  ;;  %2021 = vmatpush1.bf16.msra.mxu1 %v3916_v3  ;;  %v3919_v5 = vld [vmem:[%s4527_s29 + $0x2c] ss:$16 sps:$4 sm:$0xff]   ;;  %v3921_v6 = vld [vmem:[%s4527_s29 + $0x20] ss:$16 sps:$4 sm:$0xff]   ;;  %v3922_v7 = vld [vmem:[%s4527_s29 + $0x28] ss:$16 sps:$4 sm:$0xff]  }
  0x5d   : > { %1636 = vmatprep.subr.bf16.mxu0 %v3917_v4  ;;  %2022 = vmatprep.subr.bf16.mxu1 %v3919_v5  ;;  %v3923_v8 = vld [vmem:[%s4527_s29 + $0x44] ss:$16 sps:$4 sm:$0xff]   ;;  %v3925_v9 = vld [vmem:[%s4527_s29 + $0x4c] ss:$16 sps:$4 sm:$0xff]   ;;  %v3927_v10 = vld [vmem:[%s4527_s29 + $0x40] ss:$16 sps:$4 sm:$0xff]  }
  0x5e   : > { %v3928_v11 = vld [vmem:[%s4527_s29 + $0x48] ss:$16 sps:$4 sm:$0xff]   ;;  %v3929_v12 = vld [vmem:[%s4527_s29 + $0x64] ss:$16 sps:$4 sm:$0xff]   ;;  %v3931_v13 = vld [vmem:[%s4527_s29 + $0x6c] ss:$16 sps:$4 sm:$0xff]  }
  0x5f   : > { %v3933_v14 = vld [vmem:[%s4527_s29 + $0x60] ss:$16 sps:$4 sm:$0xff]   ;;  %v3934_v15 = vld [vmem:[%s4527_s29 + $0x68] ss:$16 sps:$4 sm:$0xff]   ;;  %v3935_v16 = vld [vmem:[%s4527_s29 + $0x84] ss:$16 sps:$4 sm:$0xff]  }
  0x60   : > { %1637 = vmatpush1.bf16.msra.mxu0 %v3921_v6  ;;  %2023 = vmatpush1.bf16.msra.mxu1 %v3922_v7  ;;  %v3937_v17 = vld [vmem:[%s4527_s29 + $0x8c] ss:$16 sps:$4 sm:$0xff]   ;;  %v3939_v18 = vld [vmem:[%s4527_s29 + $0x80] ss:$16 sps:$4 sm:$0xff]   ;;  %v3940_v19 = vld [vmem:[%s4527_s29 + $0x88] ss:$16 sps:$4 sm:$0xff]  }
  0x61   : > { %1638 = vmatprep.subr.bf16.mxu0 %v3923_v8  ;;  %2024 = vmatprep.subr.bf16.mxu1 %v3925_v9  ;;  %v3941_v20 = vld [vmem:[%s4527_s29 + $0xa4] ss:$16 sps:$4 sm:$0xff]   ;;  %v3943_v21 = vld [vmem:[%s4527_s29 + $0xac] ss:$16 sps:$4 sm:$0xff]   ;;  %v3945_v22 = vld [vmem:[%s4527_s29 + $0xa0] ss:$16 sps:$4 sm:$0xff]  }
  0x62   : > { %v3946_v23 = vld [vmem:[%s4527_s29 + $0xa8] ss:$16 sps:$4 sm:$0xff]   ;;  %v3947_v24 = vld [vmem:[%s4527_s29 + $0xc4] ss:$16 sps:$4 sm:$0xff]   ;;  %v3949_v25 = vld [vmem:[%s4527_s29 + $0xcc] ss:$16 sps:$4 sm:$0xff]  }
  0x63   : > { %v3951_v26 = vld [vmem:[%s4527_s29 + $0xc0] ss:$16 sps:$4 sm:$0xff]   ;;  %v3952_v27 = vld [vmem:[%s4527_s29 + $0xc8] ss:$16 sps:$4 sm:$0xff]   ;;  %v3953_v28 = vld [vmem:[%s4527_s29 + $0xe4] ss:$16 sps:$4 sm:$0xff]  }
  0x64   : > { %1639 = vmatpush1.bf16.msra.mxu0 %v3927_v10  ;;  %2025 = vmatpush1.bf16.msra.mxu1 %v3928_v11  ;;  %v3955_v29 = vld [vmem:[%s4527_s29 + $0xec] ss:$16 sps:$4 sm:$0xff]   ;;  %v3957_v30 = vld [vmem:[%s4527_s29 + $0xe0] ss:$16 sps:$4 sm:$0xff]   ;;  %v3958_v31 = vld [vmem:[%s4527_s29 + $0xe8] ss:$16 sps:$4 sm:$0xff]  }
  0x65   : > { %1640 = vmatprep.subr.bf16.mxu0 %v3929_v12  ;;  %2026 = vmatprep.subr.bf16.mxu1 %v3931_v13  ;;  %v3959_v32 = vld [vmem:[%s4527_s29 + $0x104] ss:$16 sps:$4 sm:$0xff]   ;;  %v3961_v33 = vld [vmem:[%s4527_s29 + $0x10c] ss:$16 sps:$4 sm:$0xff]   ;;  %v3963_v34 = vld [vmem:[%s4527_s29 + $0x100] ss:$16 sps:$4 sm:$0xff]  }
  0x66   : > { %v3964_v35 = vld [vmem:[%s4527_s29 + $0x108] ss:$16 sps:$4 sm:$0xff]   ;;  %v3965_v36 = vld [vmem:[%s4527_s29 + $0x124] ss:$16 sps:$4 sm:$0xff]   ;;  %v3967_v37 = vld [vmem:[%s4527_s29 + $0x12c] ss:$16 sps:$4 sm:$0xff]  }
  0x67   : > { %v3969_v38 = vld [vmem:[%s4527_s29 + $0x120] ss:$16 sps:$4 sm:$0xff]   ;;  %v3970_v39 = vld [vmem:[%s4527_s29 + $0x128] ss:$16 sps:$4 sm:$0xff]   ;;  %v3971_v40 = vld [vmem:[%s4527_s29 + $0x144] ss:$16 sps:$4 sm:$0xff]  }
  0x68   : > { %1641 = vmatpush1.bf16.msra.mxu0 %v3933_v14  ;;  %2027 = vmatpush1.bf16.msra.mxu1 %v3934_v15  ;;  %v3973_v41 = vld [vmem:[%s4527_s29 + $0x14c] ss:$16 sps:$4 sm:$0xff]   ;;  %v3975_v42 = vld [vmem:[%s4527_s29 + $0x140] ss:$16 sps:$4 sm:$0xff]   ;;  %v3976_v43 = vld [vmem:[%s4527_s29 + $0x148] ss:$16 sps:$4 sm:$0xff]  }
  0x69   : > { %1642 = vmatprep.subr.bf16.mxu0 %v3935_v16  ;;  %2028 = vmatprep.subr.bf16.mxu1 %v3937_v17  ;;  %v3977_v44 = vld [vmem:[%s4527_s29 + $0x164] ss:$16 sps:$4 sm:$0xff]   ;;  %v3979_v45 = vld [vmem:[%s4527_s29 + $0x16c] ss:$16 sps:$4 sm:$0xff]   ;;  %v3981_v46 = vld [vmem:[%s4527_s29 + $0x160] ss:$16 sps:$4 sm:$0xff]  }
  0x6a   : > { %v3982_v47 = vld [vmem:[%s4527_s29 + $0x168] ss:$16 sps:$4 sm:$0xff]   ;;  %v4009_v48 = vld [vmem:[#allocation3 + $0x4] ss:$16 sps:$4 sm:$0xff]   ;;  %v3985_v50 = vld [vmem:[%s4527_s29 + $0x18c] ss:$16 sps:$4 sm:$0xff]  }
  0x6b   : > { %v3983_v49 = vld [vmem:[%s4527_s29 + $0x184] ss:$16 sps:$4 sm:$0xff]   ;;  %1666 = vmatprep.mubr.bf16.mxu0 %v4009_v48  ;;  %2052 = vmatprep.mubr.bf16.mxu1 %v4009_v48  ;;  %v3987_v51 = vld [vmem:[%s4527_s29 + $0x180] ss:$16 sps:$4 sm:$0xff]   ;;  %v3988_v52 = vld [vmem:[%s4527_s29 + $0x188] ss:$16 sps:$4 sm:$0xff]  }
  0x6c   : > { %1643 = vmatpush1.bf16.msra.mxu0 %v3939_v18  ;;  %2029 = vmatpush1.bf16.msra.mxu1 %v3940_v19  ;;  %v3989_v53 = vld [vmem:[%s4527_s29 + $0x1a4] ss:$16 sps:$4 sm:$0xff]   ;;  %v3991_v54 = vld [vmem:[%s4527_s29 + $0x1ac] ss:$16 sps:$4 sm:$0xff]   ;;  %v3993_v55 = vld [vmem:[%s4527_s29 + $0x1a0] ss:$16 sps:$4 sm:$0xff]  }
  0x6d   : > { %1644 = vmatprep.subr.bf16.mxu0 %v3941_v20  ;;  %2030 = vmatprep.subr.bf16.mxu1 %v3943_v21  ;;  %v3994_v56 = vld [vmem:[%s4527_s29 + $0x1a8] ss:$16 sps:$4 sm:$0xff]   ;;  %v3995_v57 = vld [vmem:[%s4527_s29 + $0x1c4] ss:$16 sps:$4 sm:$0xff]   ;;  %v3997_v58 = vld [vmem:[%s4527_s29 + $0x1cc] ss:$16 sps:$4 sm:$0xff]  }
  0x6e   : > { %v3999_v59 = vld [vmem:[%s4527_s29 + $0x1c0] ss:$16 sps:$4 sm:$0xff]   ;;  %v4000_v60 = vld [vmem:[%s4527_s29 + $0x1c8] ss:$16 sps:$4 sm:$0xff]   ;;  %v4001_v61 = vld [vmem:[%s4527_s29 + $0x1e4] ss:$16 sps:$4 sm:$0xff]  }
  0x6f   : > { %v4003_v62 = vld [vmem:[%s4527_s29 + $0x1ec] ss:$16 sps:$4 sm:$0xff]   ;;  %v4005_v63 = vld [vmem:[%s4527_s29 + $0x1e0] ss:$16 sps:$4 sm:$0xff]   ;;  %v4006_v0 = vld [vmem:[%s4527_s29 + $0x1e8] ss:$16 sps:$4 sm:$0xff]  }
  0x70   : > { %1645 = vmatpush1.bf16.msra.mxu0 %v3945_v22  ;;  %2031 = vmatpush1.bf16.msra.mxu1 %v3946_v23  ;;  %v4012_v1 = vld [vmem:[%s4527_s29 + $0x204] ss:$16 sps:$4 sm:$0xff]   ;;  %v4015_v2 = vld [vmem:[%s4527_s29 + $0x20c] ss:$16 sps:$4 sm:$0xff]   ;;  %v4007_v3 = vld [vmem:[#allocation3] ss:$16 sps:$4 sm:$0xff]  }
  0x71   : > { %1646 = vmatprep.subr.bf16.mxu0 %v3947_v24  ;;  %2032 = vmatprep.subr.bf16.mxu1 %v3949_v25  ;;  %v4010_v4 = vld [vmem:[%s4527_s29 + $0x200] ss:$16 sps:$4 sm:$0xff]   ;;  %v4013_v5 = vld [vmem:[%s4527_s29 + $0x208] ss:$16 sps:$4 sm:$0xff]   ;;  %v4016_v6 = vld [vmem:[#allocation3 + $0x24] ss:$16 sps:$4 sm:$0xff]  }
  0x72   : > { %v4021_v7 = vld [vmem:[%s4527_s29 + $0x224] ss:$16 sps:$4 sm:$0xff]   ;;  %v4024_v8 = vld [vmem:[%s4527_s29 + $0x22c] ss:$16 sps:$4 sm:$0xff]   ;;  %v4019_v9 = vld [vmem:[%s4527_s29 + $0x220] ss:$16 sps:$4 sm:$0xff]  }
  0x73   : > { %v4022_v10 = vld [vmem:[%s4527_s29 + $0x228] ss:$16 sps:$4 sm:$0xff]   ;;  %v4030_v11 = vld [vmem:[%s4527_s29 + $0x244] ss:$16 sps:$4 sm:$0xff]   ;;  %v4033_v12 = vld [vmem:[%s4527_s29 + $0x24c] ss:$16 sps:$4 sm:$0xff]  }
  0x74   : > { %1647 = vmatpush1.bf16.msra.mxu0 %v3951_v26  ;;  %2033 = vmatpush1.bf16.msra.mxu1 %v3952_v27  ;;  %v4018_v13 = vld [vmem:[#allocation3 + $0x20] ss:$16 sps:$4 sm:$0xff]   ;;  %v4025_v14 = vld [vmem:[#allocation3 + $0x44] ss:$16 sps:$4 sm:$0xff]   ;;  %v4031_v16 = vld [vmem:[%s4527_s29 + $0x248] ss:$16 sps:$4 sm:$0xff]  }
  0x75   : > { %1648 = vmatprep.subr.bf16.mxu0 %v3953_v28  ;;  %2034 = vmatprep.subr.bf16.mxu1 %v3955_v29  ;;  %v4028_v15 = vld [vmem:[%s4527_s29 + $0x240] ss:$16 sps:$4 sm:$0xff]   ;;  %v4039_v17 = vld [vmem:[%s4527_s29 + $0x264] ss:$16 sps:$4 sm:$0xff]   ;;  %v4042_v18 = vld [vmem:[%s4527_s29 + $0x26c] ss:$16 sps:$4 sm:$0xff]  }
  0x76   : > { %v4037_v19 = vld [vmem:[%s4527_s29 + $0x260] ss:$16 sps:$4 sm:$0xff]   ;;  %v4040_v20 = vld [vmem:[%s4527_s29 + $0x268] ss:$16 sps:$4 sm:$0xff]   ;;  %v4048_v21 = vld [vmem:[%s4527_s29 + $0x284] ss:$16 sps:$4 sm:$0xff]  }
  0x77   : > { %v4051_v22 = vld [vmem:[%s4527_s29 + $0x28c] ss:$16 sps:$4 sm:$0xff]   ;;  %v4027_v23 = vld [vmem:[#allocation3 + $0x40] ss:$16 sps:$4 sm:$0xff]   ;;  %v4034_v24 = vld [vmem:[#allocation3 + $0x64] ss:$16 sps:$4 sm:$0xff]  }
  0x78   : > { %1649 = vmatpush1.bf16.msra.mxu0 %v3957_v30  ;;  %2035 = vmatpush1.bf16.msra.mxu1 %v3958_v31  ;;  %v4046_v25 = vld [vmem:[%s4527_s29 + $0x280] ss:$16 sps:$4 sm:$0xff]   ;;  %v4049_v26 = vld [vmem:[%s4527_s29 + $0x288] ss:$16 sps:$4 sm:$0xff]   ;;  %v4057_v27 = vld [vmem:[%s4527_s29 + $0x2a4] ss:$16 sps:$4 sm:$0xff]  }
  0x79   : > { %1650 = vmatprep.subr.bf16.mxu0 %v3959_v32  ;;  %2036 = vmatprep.subr.bf16.mxu1 %v3961_v33  ;;  %v4060_v28 = vld [vmem:[%s4527_s29 + $0x2ac] ss:$16 sps:$4 sm:$0xff]   ;;  %v4055_v29 = vld [vmem:[%s4527_s29 + $0x2a0] ss:$16 sps:$4 sm:$0xff]   ;;  %v4058_v30 = vld [vmem:[%s4527_s29 + $0x2a8] ss:$16 sps:$4 sm:$0xff]  }
  0x7a   : > { %v4066_v31 = vld [vmem:[%s4527_s29 + $0x2c4] ss:$16 sps:$4 sm:$0xff]   ;;  %v4069_v32 = vld [vmem:[%s4527_s29 + $0x2cc] ss:$16 sps:$4 sm:$0xff]   ;;  %v4036_v33 = vld [vmem:[#allocation3 + $0x60] ss:$16 sps:$4 sm:$0xff]  }
  0x7b   : > { %v4096_v48 = vld [vmem:[%s4527_s29 + $0x32c] ss:$16 sps:$4 sm:$0xff]   ;;  %s4662_s19 = scalar_lea.vmem [#allocation8], %s3376_s17  ;;  %s3703_s22 = sshll.u32 %s4335_s12, 8 }
  0x7c   : > { %1651 = vmatpush1.bf16.msra.mxu0 %v3963_v34  ;;  %2037 = vmatpush1.bf16.msra.mxu1 %v3964_v35  ;;  %v4043_v34 = vld [vmem:[#allocation3 + $0x84] ss:$16 sps:$4 sm:$0xff]   ;;  %v4064_v35 = vld [vmem:[%s4527_s29 + $0x2c0] ss:$16 sps:$4 sm:$0xff]   ;;  %s3258_s8 = sshll.u32 %s4662_s19, 4  ;;  %s4729_s6 = scalar_lea.hbm %s4785_s2, %s3703_s22  ;;  %s4731_s8 = int_to_ptr.vmem [resolvable:$true] %s3258_s8 }
  0x7d   : > { %1652 = vmatprep.subr.bf16.mxu0 %v3965_v36  ;;  %2038 = vmatprep.subr.bf16.mxu1 %v3967_v37  ;;  %v4067_v36 = vld [vmem:[%s4527_s29 + $0x2c8] ss:$16 sps:$4 sm:$0xff]   ;;  %v4075_v37 = vld [vmem:[%s4527_s29 + $0x2e4] ss:$16 sps:$4 sm:$0xff]   ;;  %s3242_s12 = scalar_lea.sflag [#allocation5], %s4523_s3  ;;  %s4257_s16 = scalar_lea.vmem %s4731_s8, 8192 }
  0x7e   : > { %p4258_p9 = scmp.ne.s32.totalorder %s4731_s8, %s4257_s16  ;;  %p4804_p11 = scmp.ne.s32.totalorder %s4795_s20, 0 }
  0x7f   : > { %s4350_s4 = smov [#allocation8]  }
  0x80   : > { %1653 = vmatpush1.bf16.msra.mxu0 %v3969_v38  ;;  %2039 = vmatpush1.bf16.msra.mxu1 %v3970_v39  ;;  %v4078_v38 = vld [vmem:[%s4527_s29 + $0x2ec] ss:$16 sps:$4 sm:$0xff]   ;;  %v4073_v39 = vld [vmem:[%s4527_s29 + $0x2e0] ss:$16 sps:$4 sm:$0xff]   ;;  %p4259_p4 = pnand %p4258_p9, %p4804_p11  ;;  %s4261_s23 = sshll.u32 %s4350_s4, 4  ;;  %s4262_s23 = int_to_ptr.vmem [resolvable:$false] %s4261_s23 }
  0x81   : > { %1654 = vmatprep.subr.bf16.mxu0 %v3971_v40  ;;  %2040 = vmatprep.subr.bf16.mxu1 %v3973_v41  ;;  %v4076_v40 = vld [vmem:[%s4527_s29 + $0x2e8] ss:$16 sps:$4 sm:$0xff]   ;;  %v4084_v41 = vld [vmem:[%s4527_s29 + $0x304] ss:$16 sps:$4 sm:$0xff]   ;;  %s4263_s28 = scalar_lea.vmem %s4262_s23, 16384  ;;  %p4264_p0 = scmp.lt.s32.totalorder %s4731_s8, %s4262_s23 }
  0x82   : > { %p4260_p13 = pneg %p4259_p4  ;;  %p4265_p10 = scmp.lt.s32.totalorder %s4263_s28, %s4257_s16 }
  0x84   : > { %1655 = vmatpush1.bf16.msra.mxu0 %v3975_v42  ;;  %2041 = vmatpush1.bf16.msra.mxu1 %v3976_v43  ;;  %v4087_v42 = vld [vmem:[%s4527_s29 + $0x30c] ss:$16 sps:$4 sm:$0xff]   ;;  %v4045_v43 = vld [vmem:[#allocation3 + $0x80] ss:$16 sps:$4 sm:$0xff]   ;;  %p4266_p3 = por %p4265_p10, %p4264_p0 }
  0x85   : > { %1656 = vmatprep.subr.bf16.mxu0 %v3977_v44  ;;  %2042 = vmatprep.subr.bf16.mxu1 %v3979_v45  ;;  %v4052_v44 = vld [vmem:[#allocation3 + $0xa4] ss:$16 sps:$4 sm:$0xff]   ;;  %v4082_v45 = vld [vmem:[%s4527_s29 + $0x300] ss:$16 sps:$4 sm:$0xff]  }
  0x86   : > { %p4267_p6 = pnand %p4266_p3, %p4260_p13 }
  0x88   : > { %1657 = vmatpush1.bf16.msra.mxu0 %v3981_v46  ;;  %2043 = vmatpush1.bf16.msra.mxu1 %v3982_v47  ;;  %v4085_v46 = vld [vmem:[%s4527_s29 + $0x308] ss:$16 sps:$4 sm:$0xff]   ;;  %v4093_v47 = vld [vmem:[%s4527_s29 + $0x324] ss:$16 sps:$4 sm:$0xff]  }
  0x89   : > { %1658 = vmatprep.subr.bf16.mxu0 %v3983_v49  ;;  %2044 = vmatprep.subr.bf16.mxu1 %v3985_v50  ;;  %v4091_v49 = vld [vmem:[%s4527_s29 + $0x320] ss:$16 sps:$4 sm:$0xff]   ;;  %v4094_v50 = vld [vmem:[%s4527_s29 + $0x328] ss:$16 sps:$4 sm:$0xff]  }
  0x8c   : > { %1659 = vmatpush1.bf16.msra.mxu0 %v3987_v51  ;;  %2045 = vmatpush1.bf16.msra.mxu1 %v3988_v52  ;;  %v4102_v51 = vld [vmem:[%s4527_s29 + $0x344] ss:$16 sps:$4 sm:$0xff]   ;;  %v4105_v52 = vld [vmem:[%s4527_s29 + $0x34c] ss:$16 sps:$4 sm:$0xff]  }
  0x8d   : > { %1660 = vmatprep.subr.bf16.mxu0 %v3989_v53  ;;  %2046 = vmatprep.subr.bf16.mxu1 %v3991_v54  ;;  %v4054_v53 = vld [vmem:[#allocation3 + $0xa0] ss:$16 sps:$4 sm:$0xff]   ;;  %v4061_v54 = vld [vmem:[#allocation3 + $0xc4] ss:$16 sps:$4 sm:$0xff]  }
  0x90   : > { %1661 = vmatpush1.bf16.msra.mxu0 %v3993_v55  ;;  %2047 = vmatpush1.bf16.msra.mxu1 %v3994_v56  ;;  %v4100_v55 = vld [vmem:[%s4527_s29 + $0x340] ss:$16 sps:$4 sm:$0xff]   ;;  %v4103_v56 = vld [vmem:[%s4527_s29 + $0x348] ss:$16 sps:$4 sm:$0xff]  }
  0x91   : > { %1662 = vmatprep.subr.bf16.mxu0 %v3995_v57  ;;  %2048 = vmatprep.subr.bf16.mxu1 %v3997_v58  ;;  %v4111_v57 = vld [vmem:[%s4527_s29 + $0x364] ss:$16 sps:$4 sm:$0xff]   ;;  %v4114_v58 = vld [vmem:[%s4527_s29 + $0x36c] ss:$16 sps:$4 sm:$0xff]  }
  0x94   : > { %1663 = vmatpush1.bf16.msra.mxu0 %v3999_v59  ;;  %2049 = vmatpush1.bf16.msra.mxu1 %v4000_v60  ;;  %v4109_v59 = vld [vmem:[%s4527_s29 + $0x360] ss:$16 sps:$4 sm:$0xff]   ;;  %v4112_v60 = vld [vmem:[%s4527_s29 + $0x368] ss:$16 sps:$4 sm:$0xff]  }
  0x95   : > { %1664 = vmatprep.subr.bf16.mxu0 %v4001_v61  ;;  %2050 = vmatprep.subr.bf16.mxu1 %v4003_v62  ;;  %v4120_v61 = vld [vmem:[%s4527_s29 + $0x384] ss:$16 sps:$4 sm:$0xff]   ;;  %v4123_v62 = vld [vmem:[%s4527_s29 + $0x38c] ss:$16 sps:$4 sm:$0xff]  }
  0x98   : > { %1665 = vmatpush1.bf16.msra.mxu0 %v4005_v63  ;;  %2051 = vmatpush1.bf16.msra.mxu1 %v4006_v0  ;;  %v4063_v63 = vld [vmem:[#allocation3 + $0xc0] ss:$16 sps:$4 sm:$0xff]   ;;  %v4070_v0 = vld [vmem:[#allocation3 + $0xe4] ss:$16 sps:$4 sm:$0xff]  }
  0x99   : > { %1827 = vmatprep.subr.bf16.mxu0 %v4012_v1  ;;  %2213 = vmatprep.subr.bf16.mxu1 %v4015_v2  ;;  %v4118_v1 = vld [vmem:[%s4527_s29 + $0x380] ss:$16 sps:$4 sm:$0xff]   ;;  %v4121_v2 = vld [vmem:[%s4527_s29 + $0x388] ss:$16 sps:$4 sm:$0xff]  }
  0x9b   : > { %1667 = vmatmul.mubr.bf16.vlgmr.msra.gmra.mrb[0].mxu0 %v4007_v3  ;;  %2053 = vmatmul.mubr.bf16.vlgmr.msra.gmra.mrb[0].mxu1 %v4007_v3  ;;  %v4129_v3 = vld [vmem:[%s4527_s29 + $0x3a4] ss:$16 sps:$4 sm:$0xff]  }
  0x9c   : > { %1828 = vmatpush1.bf16.msra.mxu0 %v4010_v4  ;;  %2214 = vmatpush1.bf16.msra.mxu1 %v4013_v5  ;;  %v4132_v4 = vld [vmem:[%s4527_s29 + $0x3ac] ss:$16 sps:$4 sm:$0xff]   ;;  %v4127_v5 = vld [vmem:[%s4527_s29 + $0x3a0] ss:$16 sps:$4 sm:$0xff]  }
  0x9d   : > { %1676 = vmatprep.mubr.bf16.mxu0 %v4016_v6  ;;  %2062 = vmatprep.mubr.bf16.mxu1 %v4016_v6  ;;  %v4130_v6 = vld [vmem:[%s4527_s29 + $0x3a8] ss:$16 sps:$4 sm:$0xff]  }
  0x9e   : > { %1829 = vmatprep.subr.bf16.mxu0 %v4021_v7  ;;  %2215 = vmatprep.subr.bf16.mxu1 %v4024_v8  ;;  %v4138_v7 = vld [vmem:[%s4527_s29 + $0x3c4] ss:$16 sps:$4 sm:$0xff]   ;;  %v4072_v8 = vld [vmem:[#allocation3 + $0xe0] ss:$16 sps:$4 sm:$0xff]  }
  0xa0   : > { %1830 = vmatpush1.bf16.msra.mxu0 %v4019_v9  ;;  %2216 = vmatpush1.bf16.msra.mxu1 %v4022_v10  ;;  %v4141_v9 = vld [vmem:[%s4527_s29 + $0x3cc] ss:$16 sps:$4 sm:$0xff]   ;;  %v4079_v10 = vld [vmem:[#allocation3 + $0x104] ss:$16 sps:$4 sm:$0xff]  }
  0xa1   : > { %1831 = vmatprep.subr.bf16.mxu0 %v4030_v11  ;;  %2217 = vmatprep.subr.bf16.mxu1 %v4033_v12  ;;  %v4136_v11 = vld [vmem:[%s4527_s29 + $0x3c0] ss:$16 sps:$4 sm:$0xff]   ;;  %v4139_v12 = vld [vmem:[%s4527_s29 + $0x3c8] ss:$16 sps:$4 sm:$0xff]  }
  0xa3   : > { %1677 = vmatmul.mubr.bf16.gmra.mrb[4].mxu0 %v4018_v13  ;;  %2063 = vmatmul.mubr.bf16.gmra.mrb[4].mxu1 %v4018_v13  ;;  %v4147_v13 = vld [vmem:[%s4527_s29 + $0x3e4] ss:$16 sps:$4 sm:$0xff]  }
  0xa4   : > { %1686 = vmatprep.mubr.bf16.mxu0 %v4025_v14  ;;  %2072 = vmatprep.mubr.bf16.mxu1 %v4025_v14  ;;  %v4150_v14 = vld [vmem:[%s4527_s29 + $0x3ec] ss:$16 sps:$4 sm:$0xff]  }
  0xa5   : > { %1832 = vmatpush1.bf16.msra.mxu0 %v4028_v15  ;;  %2218 = vmatpush1.bf16.msra.mxu1 %v4031_v16  ;;  %v4145_v15 = vld [vmem:[%s4527_s29 + $0x3e0] ss:$16 sps:$4 sm:$0xff]   ;;  %v4148_v16 = vld [vmem:[%s4527_s29 + $0x3e8] ss:$16 sps:$4 sm:$0xff]  }
  0xa6   : > { %1833 = vmatprep.subr.bf16.mxu0 %v4039_v17  ;;  %2219 = vmatprep.subr.bf16.mxu1 %v4042_v18  ;;  %v4081_v17 = vld [vmem:[#allocation3 + $0x100] ss:$16 sps:$4 sm:$0xff]   ;;  %v4088_v18 = vld [vmem:[#allocation3 + $0x124] ss:$16 sps:$4 sm:$0xff]  }
  0xa9   : > { %1834 = vmatpush1.bf16.msra.mxu0 %v4037_v19  ;;  %2220 = vmatpush1.bf16.msra.mxu1 %v4040_v20  ;;  %v4090_v19 = vld [vmem:[#allocation3 + $0x120] ss:$16 sps:$4 sm:$0xff]   ;;  %v4097_v20 = vld [vmem:[#allocation3 + $0x144] ss:$16 sps:$4 sm:$0xff]  }
  0xaa   : > { %1835 = vmatprep.subr.bf16.mxu0 %v4048_v21  ;;  %2221 = vmatprep.subr.bf16.mxu1 %v4051_v22  ;;  %v4099_v21 = vld [vmem:[#allocation3 + $0x140] ss:$16 sps:$4 sm:$0xff]   ;;  %v4106_v22 = vld [vmem:[#allocation3 + $0x164] ss:$16 sps:$4 sm:$0xff]  }
  0xab   : > { %1687 = vmatmul.mubr.bf16.gmra.mrb[8].mxu0 %v4027_v23  ;;  %2073 = vmatmul.mubr.bf16.gmra.mrb[8].mxu1 %v4027_v23  ;;  %v4108_v23 = vld [vmem:[#allocation3 + $0x160] ss:$16 sps:$4 sm:$0xff]  }
  0xac   : > { %1696 = vmatprep.mubr.bf16.mxu0 %v4034_v24  ;;  %2082 = vmatprep.mubr.bf16.mxu1 %v4034_v24  ;;  %v4115_v24 = vld [vmem:[#allocation3 + $0x184] ss:$16 sps:$4 sm:$0xff]  }
  0xad   : > { %1836 = vmatpush1.bf16.msra.mxu0 %v4046_v25  ;;  %2222 = vmatpush1.bf16.msra.mxu1 %v4049_v26  ;;  %v4117_v25 = vld [vmem:[#allocation3 + $0x180] ss:$16 sps:$4 sm:$0xff]   ;;  %v4124_v26 = vld [vmem:[#allocation3 + $0x1a4] ss:$16 sps:$4 sm:$0xff]  }
  0xae   : > { %1837 = vmatprep.subr.bf16.mxu0 %v4057_v27  ;;  %2223 = vmatprep.subr.bf16.mxu1 %v4060_v28  ;;  %v4126_v27 = vld [vmem:[#allocation3 + $0x1a0] ss:$16 sps:$4 sm:$0xff]   ;;  %v4133_v28 = vld [vmem:[#allocation3 + $0x1c4] ss:$16 sps:$4 sm:$0xff]  }
  0xb1   : > { %1838 = vmatpush1.bf16.msra.mxu0 %v4055_v29  ;;  %2224 = vmatpush1.bf16.msra.mxu1 %v4058_v30  ;;  %v4135_v29 = vld [vmem:[#allocation3 + $0x1c0] ss:$16 sps:$4 sm:$0xff]   ;;  %v4142_v30 = vld [vmem:[#allocation3 + $0x1e4] ss:$16 sps:$4 sm:$0xff]  }
  0xb2   : > { %1839 = vmatprep.subr.bf16.mxu0 %v4066_v31  ;;  %2225 = vmatprep.subr.bf16.mxu1 %v4069_v32  ;;  %v4144_v31 = vld [vmem:[#allocation3 + $0x1e0] ss:$16 sps:$4 sm:$0xff]   ;;  %v4153_v32 = vld [vmem:[#allocation3 + $0xc] ss:$16 sps:$4 sm:$0xff]  }
  0xb3   : > { %1697 = vmatmul.mubr.bf16.gmra.mrb[12].mxu0 %v4036_v33  ;;  %2083 = vmatmul.mubr.bf16.gmra.mrb[12].mxu1 %v4036_v33  ;;  %v4151_v33 = vld [vmem:[#allocation3 + $0x8] ss:$16 sps:$4 sm:$0xff]  }
  0xb4   : > { %1706 = vmatprep.mubr.bf16.mxu0 %v4043_v34  ;;  %2092 = vmatprep.mubr.bf16.mxu1 %v4043_v34  ;;  %v4154_v34 = vld [vmem:[#allocation3 + $0x2c] ss:$16 sps:$4 sm:$0xff]  }
  0xb5   : > { %1840 = vmatpush1.bf16.msra.mxu0 %v4064_v35  ;;  %2226 = vmatpush1.bf16.msra.mxu1 %v4067_v36  ;;  %v4156_v35 = vld [vmem:[#allocation3 + $0x28] ss:$16 sps:$4 sm:$0xff]   ;;  %v4157_v36 = vld [vmem:[#allocation3 + $0x4c] ss:$16 sps:$4 sm:$0xff]  }
  0xb6   : > { %1841 = vmatprep.subr.bf16.mxu0 %v4075_v37  ;;  %2227 = vmatprep.subr.bf16.mxu1 %v4078_v38  ;;  %v4159_v37 = vld [vmem:[#allocation3 + $0x48] ss:$16 sps:$4 sm:$0xff]   ;;  %v4160_v38 = vld [vmem:[#allocation3 + $0x6c] ss:$16 sps:$4 sm:$0xff]  }
  0xb9   : > { %1842 = vmatpush1.bf16.msra.mxu0 %v4073_v39  ;;  %2228 = vmatpush1.bf16.msra.mxu1 %v4076_v40  ;;  %v4162_v39 = vld [vmem:[#allocation3 + $0x68] ss:$16 sps:$4 sm:$0xff]   ;;  %v4163_v40 = vld [vmem:[#allocation3 + $0x8c] ss:$16 sps:$4 sm:$0xff]  }
  0xba   : > { %1843 = vmatprep.subr.bf16.mxu0 %v4084_v41  ;;  %2229 = vmatprep.subr.bf16.mxu1 %v4087_v42  ;;  %v4165_v41 = vld [vmem:[#allocation3 + $0x88] ss:$16 sps:$4 sm:$0xff]   ;;  %v4166_v42 = vld [vmem:[#allocation3 + $0xac] ss:$16 sps:$4 sm:$0xff]  }
  0xbb   : > { %1707 = vmatmul.mubr.bf16.gmra.mrb[16].mxu0 %v4045_v43  ;;  %2093 = vmatmul.mubr.bf16.gmra.mrb[16].mxu1 %v4045_v43  ;;  %v4168_v43 = vld [vmem:[#allocation3 + $0xa8] ss:$16 sps:$4 sm:$0xff]  }
  0xbc   : > { %1716 = vmatprep.mubr.bf16.mxu0 %v4052_v44  ;;  %2102 = vmatprep.mubr.bf16.mxu1 %v4052_v44  ;;  %v4169_v44 = vld [vmem:[#allocation3 + $0xcc] ss:$16 sps:$4 sm:$0xff]  }
  0xbd   : > { %1844 = vmatpush1.bf16.msra.mxu0 %v4082_v45  ;;  %2230 = vmatpush1.bf16.msra.mxu1 %v4085_v46  ;;  %v4171_v45 = vld [vmem:[#allocation3 + $0xc8] ss:$16 sps:$4 sm:$0xff]   ;;  %v4172_v46 = vld [vmem:[#allocation3 + $0xec] ss:$16 sps:$4 sm:$0xff]  }
  0xbe   : > { %1845 = vmatprep.subr.bf16.mxu0 %v4093_v47  ;;  %2231 = vmatprep.subr.bf16.mxu1 %v4096_v48  ;;  %v4174_v47 = vld [vmem:[#allocation3 + $0xe8] ss:$16 sps:$4 sm:$0xff]   ;;  %v4175_v48 = vld [vmem:[#allocation3 + $0x10c] ss:$16 sps:$4 sm:$0xff]  }
  0xc1   : > { %1846 = vmatpush1.bf16.msra.mxu0 %v4091_v49  ;;  %2232 = vmatpush1.bf16.msra.mxu1 %v4094_v50  ;;  %v4177_v49 = vld [vmem:[#allocation3 + $0x108] ss:$16 sps:$4 sm:$0xff]   ;;  %v4178_v50 = vld [vmem:[#allocation3 + $0x12c] ss:$16 sps:$4 sm:$0xff]  }
  0xc2   : > { %1847 = vmatprep.subr.bf16.mxu0 %v4102_v51  ;;  %2233 = vmatprep.subr.bf16.mxu1 %v4105_v52  ;;  %v4180_v51 = vld [vmem:[#allocation3 + $0x128] ss:$16 sps:$4 sm:$0xff]   ;;  %v4181_v52 = vld [vmem:[#allocation3 + $0x14c] ss:$16 sps:$4 sm:$0xff]  }
  0xc3   : > { %1717 = vmatmul.mubr.bf16.gmra.mrb[20].mxu0 %v4054_v53  ;;  %2103 = vmatmul.mubr.bf16.gmra.mrb[20].mxu1 %v4054_v53  ;;  %v4183_v53 = vld [vmem:[#allocation3 + $0x148] ss:$16 sps:$4 sm:$0xff]  }
  0xc4   : > { %1726 = vmatprep.mubr.bf16.mxu0 %v4061_v54  ;;  %2112 = vmatprep.mubr.bf16.mxu1 %v4061_v54  ;;  %v4184_v54 = vld [vmem:[#allocation3 + $0x16c] ss:$16 sps:$4 sm:$0xff]  }
  0xc5   : > { %1848 = vmatpush1.bf16.msra.mxu0 %v4100_v55  ;;  %2234 = vmatpush1.bf16.msra.mxu1 %v4103_v56  ;;  %v4186_v55 = vld [vmem:[#allocation3 + $0x168] ss:$16 sps:$4 sm:$0xff]   ;;  %v4187_v56 = vld [vmem:[#allocation3 + $0x18c] ss:$16 sps:$4 sm:$0xff]  }
  0xc6   : > { %1849 = vmatprep.subr.bf16.mxu0 %v4111_v57  ;;  %2235 = vmatprep.subr.bf16.mxu1 %v4114_v58  ;;  %v4189_v57 = vld [vmem:[#allocation3 + $0x188] ss:$16 sps:$4 sm:$0xff]   ;;  %v4190_v58 = vld [vmem:[#allocation3 + $0x1ac] ss:$16 sps:$4 sm:$0xff]  }
  0xc9   : > { %1850 = vmatpush1.bf16.msra.mxu0 %v4109_v59  ;;  %2236 = vmatpush1.bf16.msra.mxu1 %v4112_v60  ;;  %v4192_v59 = vld [vmem:[#allocation3 + $0x1a8] ss:$16 sps:$4 sm:$0xff]   ;;  %v4193_v60 = vld [vmem:[#allocation3 + $0x1cc] ss:$16 sps:$4 sm:$0xff]  }
  0xca   : > { %1851 = vmatprep.subr.bf16.mxu0 %v4120_v61  ;;  %2237 = vmatprep.subr.bf16.mxu1 %v4123_v62  ;;  %v4195_v61 = vld [vmem:[#allocation3 + $0x1c8] ss:$16 sps:$4 sm:$0xff]   ;;  %v4196_v62 = vld [vmem:[#allocation3 + $0x1ec] ss:$16 sps:$4 sm:$0xff]  }
  0xcb   : > { %1727 = vmatmul.mubr.bf16.gmra.mrb[24].mxu0 %v4063_v63  ;;  %2113 = vmatmul.mubr.bf16.gmra.mrb[24].mxu1 %v4063_v63  ;;  %v4198_v63 = vld [vmem:[#allocation3 + $0x1e8] ss:$16 sps:$4 sm:$0xff]  }
  0xcc   : > { %1736 = vmatprep.mubr.bf16.mxu0 %v4070_v0  ;;  %2122 = vmatprep.mubr.bf16.mxu1 %v4070_v0 }
  0xcd   : > { %1852 = vmatpush1.bf16.msra.mxu0 %v4118_v1  ;;  %2238 = vmatpush1.bf16.msra.mxu1 %v4121_v2 }
  0xce   : > { %1853 = vmatprep.subr.bf16.mxu0 %v4129_v3  ;;  %2239 = vmatprep.subr.bf16.mxu1 %v4132_v4 }
  0xd1   : > { %1854 = vmatpush1.bf16.msra.mxu0 %v4127_v5  ;;  %2240 = vmatpush1.bf16.msra.mxu1 %v4130_v6 }
  0xd2   : > { %1855 = vmatprep.subr.bf16.mxu0 %v4138_v7  ;;  %2241 = vmatprep.subr.bf16.mxu1 %v4141_v9 }
  0xd3   : > { %1737 = vmatmul.mubr.bf16.gmra.mrb[28].mxu0 %v4072_v8  ;;  %2123 = vmatmul.mubr.bf16.gmra.mrb[28].mxu1 %v4072_v8 }
  0xd4   : > { %1746 = vmatprep.mubr.bf16.mxu0 %v4079_v10  ;;  %2132 = vmatprep.mubr.bf16.mxu1 %v4079_v10 }
  0xd5   : > { %1856 = vmatpush1.bf16.msra.mxu0 %v4136_v11  ;;  %2242 = vmatpush1.bf16.msra.mxu1 %v4139_v12 }
  0xd6   : > { %1857 = vmatprep.subr.bf16.mxu0 %v4147_v13  ;;  %2243 = vmatprep.subr.bf16.mxu1 %v4150_v14 }
  0xd9   : > { %1858 = vmatpush1.bf16.msra.mxu0 %v4145_v15  ;;  %2244 = vmatpush1.bf16.msra.mxu1 %v4148_v16 }
  0xdb   : > { %1747 = vmatmul.mubr.bf16.gmra.mrb[32].mxu0 %v4081_v17  ;;  %2133 = vmatmul.mubr.bf16.gmra.mrb[32].mxu1 %v4081_v17 }
  0xdc   : > { %1756 = vmatprep.mubr.bf16.mxu0 %v4088_v18  ;;  %2142 = vmatprep.mubr.bf16.mxu1 %v4088_v18 }
  0xe3   : > { %1757 = vmatmul.mubr.bf16.gmra.mrb[36].mxu0 %v4090_v19  ;;  %2143 = vmatmul.mubr.bf16.gmra.mrb[36].mxu1 %v4090_v19 }
  0xe4   : > { %1766 = vmatprep.mubr.bf16.mxu0 %v4097_v20  ;;  %2152 = vmatprep.mubr.bf16.mxu1 %v4097_v20 }
  0xeb   : > { %1767 = vmatmul.mubr.bf16.gmra.mrb[40].mxu0 %v4099_v21  ;;  %2153 = vmatmul.mubr.bf16.gmra.mrb[40].mxu1 %v4099_v21 }
  0xec   : > { %1776 = vmatprep.mubr.bf16.mxu0 %v4106_v22  ;;  %2162 = vmatprep.mubr.bf16.mxu1 %v4106_v22 }
  0xf3   : > { %1777 = vmatmul.mubr.bf16.gmra.mrb[44].mxu0 %v4108_v23  ;;  %2163 = vmatmul.mubr.bf16.gmra.mrb[44].mxu1 %v4108_v23 }
  0xf4   : > { %1786 = vmatprep.mubr.bf16.mxu0 %v4115_v24  ;;  %2172 = vmatprep.mubr.bf16.mxu1 %v4115_v24 }
  0xfb   : > { %1787 = vmatmul.mubr.bf16.gmra.mrb[48].mxu0 %v4117_v25  ;;  %2173 = vmatmul.mubr.bf16.gmra.mrb[48].mxu1 %v4117_v25 }
  0xfc   : > { %1796 = vmatprep.mubr.bf16.mxu0 %v4124_v26  ;;  %2182 = vmatprep.mubr.bf16.mxu1 %v4124_v26 }
 0x103   : > { %1797 = vmatmul.mubr.bf16.gmra.mrb[52].mxu0 %v4126_v27  ;;  %2183 = vmatmul.mubr.bf16.gmra.mrb[52].mxu1 %v4126_v27 }
 0x104   : > { %1806 = vmatprep.mubr.bf16.mxu0 %v4133_v28  ;;  %2192 = vmatprep.mubr.bf16.mxu1 %v4133_v28 }
 0x10b   : > { %1807 = vmatmul.mubr.bf16.gmra.mrb[56].mxu0 %v4135_v29  ;;  %2193 = vmatmul.mubr.bf16.gmra.mrb[56].mxu1 %v4135_v29 }
 0x10c   : > { %1816 = vmatprep.mubr.bf16.mxu0 %v4142_v30  ;;  %2202 = vmatprep.mubr.bf16.mxu1 %v4142_v30 }
 0x113   : > { %1817 = vmatmul.mubr.bf16.gmra.mrb[60].mxu0 %v4144_v31  ;;  %2203 = vmatmul.mubr.bf16.gmra.mrb[60].mxu1 %v4144_v31 }
 0x114   : > { %1859 = vmatprep.mubr.bf16.mxu0 %v4153_v32  ;;  %2245 = vmatprep.mubr.bf16.mxu1 %v4153_v32 }
 0x11b   : > { %1860 = vmatmul.mubr.bf16.vlgmr.msra.gmra.mrb[0].mxu0 %v4151_v33  ;;  %2246 = vmatmul.mubr.bf16.vlgmr.msra.gmra.mrb[0].mxu1 %v4151_v33 }
 0x11c   : > { %1869 = vmatprep.mubr.bf16.mxu0 %v4154_v34  ;;  %2255 = vmatprep.mubr.bf16.mxu1 %v4154_v34 }
 0x123   : > { %1870 = vmatmul.mubr.bf16.gmra.mrb[4].mxu0 %v4156_v35  ;;  %2256 = vmatmul.mubr.bf16.gmra.mrb[4].mxu1 %v4156_v35 }
 0x124   : > { %1879 = vmatprep.mubr.bf16.mxu0 %v4157_v36  ;;  %2265 = vmatprep.mubr.bf16.mxu1 %v4157_v36 }
 0x12b   : > { %1880 = vmatmul.mubr.bf16.gmra.mrb[8].mxu0 %v4159_v37  ;;  %2266 = vmatmul.mubr.bf16.gmra.mrb[8].mxu1 %v4159_v37 }
 0x12c   : > { %1889 = vmatprep.mubr.bf16.mxu0 %v4160_v38  ;;  %2275 = vmatprep.mubr.bf16.mxu1 %v4160_v38 }
 0x133   : > { %1890 = vmatmul.mubr.bf16.gmra.mrb[12].mxu0 %v4162_v39  ;;  %2276 = vmatmul.mubr.bf16.gmra.mrb[12].mxu1 %v4162_v39 }
 0x134   : > { %1899 = vmatprep.mubr.bf16.mxu0 %v4163_v40  ;;  %2285 = vmatprep.mubr.bf16.mxu1 %v4163_v40 }
 0x13b   : > { %1900 = vmatmul.mubr.bf16.gmra.mrb[16].mxu0 %v4165_v41  ;;  %2286 = vmatmul.mubr.bf16.gmra.mrb[16].mxu1 %v4165_v41 }
 0x13c   : > { %1909 = vmatprep.mubr.bf16.mxu0 %v4166_v42  ;;  %2295 = vmatprep.mubr.bf16.mxu1 %v4166_v42 }
 0x143   : > { %1910 = vmatmul.mubr.bf16.gmra.mrb[20].mxu0 %v4168_v43  ;;  %2296 = vmatmul.mubr.bf16.gmra.mrb[20].mxu1 %v4168_v43 }
 0x144   : > { %1919 = vmatprep.mubr.bf16.mxu0 %v4169_v44  ;;  %2305 = vmatprep.mubr.bf16.mxu1 %v4169_v44 }
 0x14b   : > { %1920 = vmatmul.mubr.bf16.gmra.mrb[24].mxu0 %v4171_v45  ;;  %2306 = vmatmul.mubr.bf16.gmra.mrb[24].mxu1 %v4171_v45 }
 0x14c   : > { %1929 = vmatprep.mubr.bf16.mxu0 %v4172_v46  ;;  %2315 = vmatprep.mubr.bf16.mxu1 %v4172_v46 }
 0x153   : > { %1930 = vmatmul.mubr.bf16.gmra.mrb[28].mxu0 %v4174_v47  ;;  %2316 = vmatmul.mubr.bf16.gmra.mrb[28].mxu1 %v4174_v47 }
 0x154   : > { %1939 = vmatprep.mubr.bf16.mxu0 %v4175_v48  ;;  %2325 = vmatprep.mubr.bf16.mxu1 %v4175_v48 }
 0x15b   : > { %1940 = vmatmul.mubr.bf16.gmra.mrb[32].mxu0 %v4177_v49  ;;  %2326 = vmatmul.mubr.bf16.gmra.mrb[32].mxu1 %v4177_v49 }
 0x15c   : > { %1949 = vmatprep.mubr.bf16.mxu0 %v4178_v50  ;;  %2335 = vmatprep.mubr.bf16.mxu1 %v4178_v50 }
 0x163   : > { %1950 = vmatmul.mubr.bf16.gmra.mrb[36].mxu0 %v4180_v51  ;;  %2336 = vmatmul.mubr.bf16.gmra.mrb[36].mxu1 %v4180_v51 }
 0x164   : > { %1959 = vmatprep.mubr.bf16.mxu0 %v4181_v52  ;;  %2345 = vmatprep.mubr.bf16.mxu1 %v4181_v52 }
 0x16b   : > { %1960 = vmatmul.mubr.bf16.gmra.mrb[40].mxu0 %v4183_v53  ;;  %2346 = vmatmul.mubr.bf16.gmra.mrb[40].mxu1 %v4183_v53 }
 0x16c   : > { %1969 = vmatprep.mubr.bf16.mxu0 %v4184_v54  ;;  %2355 = vmatprep.mubr.bf16.mxu1 %v4184_v54 }
 0x173   : > { %1970 = vmatmul.mubr.bf16.gmra.mrb[44].mxu0 %v4186_v55  ;;  %2356 = vmatmul.mubr.bf16.gmra.mrb[44].mxu1 %v4186_v55 }
 0x174   : > { %1979 = vmatprep.mubr.bf16.mxu0 %v4187_v56  ;;  %2365 = vmatprep.mubr.bf16.mxu1 %v4187_v56 }
 0x17b   : > { %1980 = vmatmul.mubr.bf16.gmra.mrb[48].mxu0 %v4189_v57  ;;  %2366 = vmatmul.mubr.bf16.gmra.mrb[48].mxu1 %v4189_v57 }
 0x17c   : > { %1989 = vmatprep.mubr.bf16.mxu0 %v4190_v58  ;;  %2375 = vmatprep.mubr.bf16.mxu1 %v4190_v58 }
 0x183   : > { %1990 = vmatmul.mubr.bf16.gmra.mrb[52].mxu0 %v4192_v59  ;;  %2376 = vmatmul.mubr.bf16.gmra.mrb[52].mxu1 %v4192_v59 }
 0x184   : > { %1999 = vmatprep.mubr.bf16.mxu0 %v4193_v60  ;;  %2385 = vmatprep.mubr.bf16.mxu1 %v4193_v60 }
 0x18b   : > { %2000 = vmatmul.mubr.bf16.gmra.mrb[56].mxu0 %v4195_v61  ;;  %2386 = vmatmul.mubr.bf16.gmra.mrb[56].mxu1 %v4195_v61 }
 0x18c   : > { %2009 = vmatprep.mubr.bf16.mxu0 %v4196_v62  ;;  %2395 = vmatprep.mubr.bf16.mxu1 %v4196_v62 }
 0x193   : > { %2010 = vmatmul.mubr.bf16.gmra.mrb[60].mxu0 %v4198_v63  ;;  %2396 = vmatmul.mubr.bf16.gmra.mrb[60].mxu1 %v4198_v63 }
 0x1ee   : > { %v1861_v0 = vpop.f32.mrb[0].mxu0  ;;  %v2247_v1 = vpop.f32.mrb[0].mxu1 }
 0x1ef   : > { %v1863_v2 = vpop.f32.mrb[1].mxu0  ;;  %v2249_v3 = vpop.f32.mrb[1].mxu1 }
 0x1f0   : > { %v3639_v4 = vpack.c.bf16 %v1863_v2, %v1861_v0  ;;  %v3640_v5 = vpack.c.bf16 %v2249_v3, %v2247_v1  ;;  %v1865_v6 = vpop.f32.mrb[2].mxu0  ;;  %v2251_v7 = vpop.f32.mrb[2].mxu1 }
 0x1f1   : > { %v1867_v8 = vpop.f32.mrb[3].mxu0  ;;  %v2253_v9 = vpop.f32.mrb[3].mxu1 }
 0x1f2   : > { %3177 = vst [vmem:[%s4662_s19] sm:$0xff] %v3639_v4  ;;  %3178 = vst [vmem:[%s4662_s19 + $0x8] sm:$0xff] %v3640_v5  ;;  %v3641_v10 = vpack.c.bf16 %v1867_v8, %v1865_v6  ;;  %v3642_v11 = vpack.c.bf16 %v2253_v9, %v2251_v7 }
 0x1f4   : > { %3179 = vst [vmem:[%s4662_s19 + $0x10] sm:$0xff] %v3641_v10  ;;  %3180 = vst [vmem:[%s4662_s19 + $0x18] sm:$0xff] %v3642_v11 }
 0x1f6   : > { %v1871_v12 = vpop.f32.mrb[4].mxu0  ;;  %v2257_v13 = vpop.f32.mrb[4].mxu1 }
 0x1f7   : > { %v1873_v14 = vpop.f32.mrb[5].mxu0  ;;  %v2259_v15 = vpop.f32.mrb[5].mxu1 }
 0x1f8   : > { %v3643_v16 = vpack.c.bf16 %v1873_v14, %v1871_v12  ;;  %v3644_v17 = vpack.c.bf16 %v2259_v15, %v2257_v13  ;;  %v1875_v18 = vpop.f32.mrb[6].mxu0  ;;  %v2261_v19 = vpop.f32.mrb[6].mxu1 }
 0x1f9   : > { %v1877_v20 = vpop.f32.mrb[7].mxu0  ;;  %v2263_v21 = vpop.f32.mrb[7].mxu1 }
 0x1fa   : > { %3181 = vst [vmem:[%s4662_s19 + $0x20] sm:$0xff] %v3643_v16  ;;  %3182 = vst [vmem:[%s4662_s19 + $0x28] sm:$0xff] %v3644_v17  ;;  %v3645_v22 = vpack.c.bf16 %v1877_v20, %v1875_v18  ;;  %v3646_v23 = vpack.c.bf16 %v2263_v21, %v2261_v19 }
 0x1fc   : > { %3183 = vst [vmem:[%s4662_s19 + $0x30] sm:$0xff] %v3645_v22  ;;  %3184 = vst [vmem:[%s4662_s19 + $0x38] sm:$0xff] %v3646_v23 }
 0x1fe   : > { %v1881_v24 = vpop.f32.mrb[8].mxu0  ;;  %v2267_v25 = vpop.f32.mrb[8].mxu1 }
 0x1ff   : > { %v1883_v26 = vpop.f32.mrb[9].mxu0  ;;  %v2269_v27 = vpop.f32.mrb[9].mxu1 }
 0x200   : > { %v3647_v28 = vpack.c.bf16 %v1883_v26, %v1881_v24  ;;  %v3648_v29 = vpack.c.bf16 %v2269_v27, %v2267_v25  ;;  %v1885_v30 = vpop.f32.mrb[10].mxu0  ;;  %v2271_v31 = vpop.f32.mrb[10].mxu1 }
 0x201   : > { %v1887_v32 = vpop.f32.mrb[11].mxu0  ;;  %v2273_v33 = vpop.f32.mrb[11].mxu1 }
 0x202   : > { %3185 = vst [vmem:[%s4662_s19 + $0x40] sm:$0xff] %v3647_v28  ;;  %3186 = vst [vmem:[%s4662_s19 + $0x48] sm:$0xff] %v3648_v29  ;;  %v3649_v34 = vpack.c.bf16 %v1887_v32, %v1885_v30  ;;  %v3650_v35 = vpack.c.bf16 %v2273_v33, %v2271_v31 }
 0x204   : > { %3187 = vst [vmem:[%s4662_s19 + $0x50] sm:$0xff] %v3649_v34  ;;  %3188 = vst [vmem:[%s4662_s19 + $0x58] sm:$0xff] %v3650_v35 }
 0x206   : > { %v1891_v36 = vpop.f32.mrb[12].mxu0  ;;  %v2277_v37 = vpop.f32.mrb[12].mxu1 }
 0x207   : > { %v1893_v38 = vpop.f32.mrb[13].mxu0  ;;  %v2279_v39 = vpop.f32.mrb[13].mxu1 }
 0x208   : > { %v3651_v40 = vpack.c.bf16 %v1893_v38, %v1891_v36  ;;  %v3652_v41 = vpack.c.bf16 %v2279_v39, %v2277_v37  ;;  %v1895_v42 = vpop.f32.mrb[14].mxu0  ;;  %v2281_v43 = vpop.f32.mrb[14].mxu1 }
 0x209   : > { %v1897_v44 = vpop.f32.mrb[15].mxu0  ;;  %v2283_v45 = vpop.f32.mrb[15].mxu1 }
 0x20a   : > { %3189 = vst [vmem:[%s4662_s19 + $0x60] sm:$0xff] %v3651_v40  ;;  %3190 = vst [vmem:[%s4662_s19 + $0x68] sm:$0xff] %v3652_v41  ;;  %v3653_v46 = vpack.c.bf16 %v1897_v44, %v1895_v42  ;;  %v3654_v47 = vpack.c.bf16 %v2283_v45, %v2281_v43 }
 0x20c   : > { %3191 = vst [vmem:[%s4662_s19 + $0x70] sm:$0xff] %v3653_v46  ;;  %3192 = vst [vmem:[%s4662_s19 + $0x78] sm:$0xff] %v3654_v47 }
 0x20e   : > { %v1901_v48 = vpop.f32.mrb[16].mxu0  ;;  %v2287_v49 = vpop.f32.mrb[16].mxu1 }
 0x20f   : > { %v1903_v50 = vpop.f32.mrb[17].mxu0  ;;  %v2289_v51 = vpop.f32.mrb[17].mxu1 }
 0x210   : > { %v3655_v52 = vpack.c.bf16 %v1903_v50, %v1901_v48  ;;  %v3656_v53 = vpack.c.bf16 %v2289_v51, %v2287_v49  ;;  %v1905_v54 = vpop.f32.mrb[18].mxu0  ;;  %v2291_v55 = vpop.f32.mrb[18].mxu1 }
 0x211   : > { %v1907_v56 = vpop.f32.mrb[19].mxu0  ;;  %v2293_v57 = vpop.f32.mrb[19].mxu1 }
 0x212   : > { %3193 = vst [vmem:[%s4662_s19 + $0x80] sm:$0xff] %v3655_v52  ;;  %3194 = vst [vmem:[%s4662_s19 + $0x88] sm:$0xff] %v3656_v53  ;;  %v3657_v58 = vpack.c.bf16 %v1907_v56, %v1905_v54  ;;  %v3658_v59 = vpack.c.bf16 %v2293_v57, %v2291_v55 }
 0x214   : > { %3195 = vst [vmem:[%s4662_s19 + $0x90] sm:$0xff] %v3657_v58  ;;  %3196 = vst [vmem:[%s4662_s19 + $0x98] sm:$0xff] %v3658_v59 }
 0x216   : > { %v1911_v60 = vpop.f32.mrb[20].mxu0  ;;  %v2297_v61 = vpop.f32.mrb[20].mxu1 }
 0x217   : > { %v1913_v62 = vpop.f32.mrb[21].mxu0  ;;  %v2299_v63 = vpop.f32.mrb[21].mxu1 }
 0x218   : > { %v3659_v0 = vpack.c.bf16 %v1913_v62, %v1911_v60  ;;  %v3660_v1 = vpack.c.bf16 %v2299_v63, %v2297_v61  ;;  %v1915_v2 = vpop.f32.mrb[22].mxu0  ;;  %v2301_v3 = vpop.f32.mrb[22].mxu1 }
 0x219   : > { %v1917_v4 = vpop.f32.mrb[23].mxu0  ;;  %v2303_v5 = vpop.f32.mrb[23].mxu1 }
 0x21a   : > { %3197 = vst [vmem:[%s4662_s19 + $0xa0] sm:$0xff] %v3659_v0  ;;  %3198 = vst [vmem:[%s4662_s19 + $0xa8] sm:$0xff] %v3660_v1  ;;  %v3661_v6 = vpack.c.bf16 %v1917_v4, %v1915_v2  ;;  %v3662_v7 = vpack.c.bf16 %v2303_v5, %v2301_v3 }
 0x21c   : > { %3199 = vst [vmem:[%s4662_s19 + $0xb0] sm:$0xff] %v3661_v6  ;;  %3200 = vst [vmem:[%s4662_s19 + $0xb8] sm:$0xff] %v3662_v7 }
 0x21e   : > { %v1921_v8 = vpop.f32.mrb[24].mxu0  ;;  %v2307_v9 = vpop.f32.mrb[24].mxu1 }
 0x21f   : > { %v1923_v10 = vpop.f32.mrb[25].mxu0  ;;  %v2309_v11 = vpop.f32.mrb[25].mxu1 }
 0x220   : > { %v3663_v12 = vpack.c.bf16 %v1923_v10, %v1921_v8  ;;  %v3664_v13 = vpack.c.bf16 %v2309_v11, %v2307_v9  ;;  %v1925_v14 = vpop.f32.mrb[26].mxu0  ;;  %v2311_v15 = vpop.f32.mrb[26].mxu1 }
 0x221   : > { %v1927_v16 = vpop.f32.mrb[27].mxu0  ;;  %v2313_v17 = vpop.f32.mrb[27].mxu1 }
 0x222   : > { %3201 = vst [vmem:[%s4662_s19 + $0xc0] sm:$0xff] %v3663_v12  ;;  %3202 = vst [vmem:[%s4662_s19 + $0xc8] sm:$0xff] %v3664_v13  ;;  %v3665_v18 = vpack.c.bf16 %v1927_v16, %v1925_v14  ;;  %v3666_v19 = vpack.c.bf16 %v2313_v17, %v2311_v15 }
 0x224   : > { %3203 = vst [vmem:[%s4662_s19 + $0xd0] sm:$0xff] %v3665_v18  ;;  %3204 = vst [vmem:[%s4662_s19 + $0xd8] sm:$0xff] %v3666_v19 }
 0x226   : > { %v1931_v20 = vpop.f32.mrb[28].mxu0  ;;  %v2317_v21 = vpop.f32.mrb[28].mxu1 }
 0x227   : > { %v1933_v22 = vpop.f32.mrb[29].mxu0  ;;  %v2319_v23 = vpop.f32.mrb[29].mxu1 }
 0x228   : > { %v3667_v24 = vpack.c.bf16 %v1933_v22, %v1931_v20  ;;  %v3668_v25 = vpack.c.bf16 %v2319_v23, %v2317_v21  ;;  %v1935_v26 = vpop.f32.mrb[30].mxu0  ;;  %v2321_v27 = vpop.f32.mrb[30].mxu1 }
 0x229   : > { %v1937_v28 = vpop.f32.mrb[31].mxu0  ;;  %v2323_v29 = vpop.f32.mrb[31].mxu1 }
 0x22a   : > { %3205 = vst [vmem:[%s4662_s19 + $0xe0] sm:$0xff] %v3667_v24  ;;  %3206 = vst [vmem:[%s4662_s19 + $0xe8] sm:$0xff] %v3668_v25  ;;  %v3669_v30 = vpack.c.bf16 %v1937_v28, %v1935_v26  ;;  %v3670_v31 = vpack.c.bf16 %v2323_v29, %v2321_v27 }
 0x22c   : > { %3207 = vst [vmem:[%s4662_s19 + $0xf0] sm:$0xff] %v3669_v30  ;;  %3208 = vst [vmem:[%s4662_s19 + $0xf8] sm:$0xff] %v3670_v31 }
 0x22e   : > { %v1941_v32 = vpop.f32.mrb[32].mxu0  ;;  %v2327_v33 = vpop.f32.mrb[32].mxu1 }
 0x22f   : > { %v1943_v34 = vpop.f32.mrb[33].mxu0  ;;  %v2329_v35 = vpop.f32.mrb[33].mxu1 }
 0x230   : > { %v3671_v36 = vpack.c.bf16 %v1943_v34, %v1941_v32  ;;  %v3672_v37 = vpack.c.bf16 %v2329_v35, %v2327_v33  ;;  %v1945_v38 = vpop.f32.mrb[34].mxu0  ;;  %v2331_v39 = vpop.f32.mrb[34].mxu1 }
 0x231   : > { %v1947_v40 = vpop.f32.mrb[35].mxu0  ;;  %v2333_v41 = vpop.f32.mrb[35].mxu1 }
 0x232   : > { %3209 = vst [vmem:[%s4662_s19 + $0x100] sm:$0xff] %v3671_v36  ;;  %3210 = vst [vmem:[%s4662_s19 + $0x108] sm:$0xff] %v3672_v37  ;;  %v3673_v42 = vpack.c.bf16 %v1947_v40, %v1945_v38  ;;  %v3674_v43 = vpack.c.bf16 %v2333_v41, %v2331_v39 }
 0x234   : > { %3211 = vst [vmem:[%s4662_s19 + $0x110] sm:$0xff] %v3673_v42  ;;  %3212 = vst [vmem:[%s4662_s19 + $0x118] sm:$0xff] %v3674_v43 }
 0x236   : > { %v1951_v44 = vpop.f32.mrb[36].mxu0  ;;  %v2337_v45 = vpop.f32.mrb[36].mxu1 }
 0x237   : > { %v1953_v46 = vpop.f32.mrb[37].mxu0  ;;  %v2339_v47 = vpop.f32.mrb[37].mxu1 }
 0x238   : > { %v3675_v48 = vpack.c.bf16 %v1953_v46, %v1951_v44  ;;  %v3676_v49 = vpack.c.bf16 %v2339_v47, %v2337_v45  ;;  %v1955_v50 = vpop.f32.mrb[38].mxu0  ;;  %v2341_v51 = vpop.f32.mrb[38].mxu1 }
 0x239   : > { %v1957_v52 = vpop.f32.mrb[39].mxu0  ;;  %v2343_v53 = vpop.f32.mrb[39].mxu1 }
 0x23a   : > { %3213 = vst [vmem:[%s4662_s19 + $0x120] sm:$0xff] %v3675_v48  ;;  %3214 = vst [vmem:[%s4662_s19 + $0x128] sm:$0xff] %v3676_v49  ;;  %v3677_v54 = vpack.c.bf16 %v1957_v52, %v1955_v50  ;;  %v3678_v55 = vpack.c.bf16 %v2343_v53, %v2341_v51 }
 0x23c   : > { %3215 = vst [vmem:[%s4662_s19 + $0x130] sm:$0xff] %v3677_v54  ;;  %3216 = vst [vmem:[%s4662_s19 + $0x138] sm:$0xff] %v3678_v55 }
 0x23e   : > { %v1961_v56 = vpop.f32.mrb[40].mxu0  ;;  %v2347_v57 = vpop.f32.mrb[40].mxu1 }
 0x23f   : > { %v1963_v58 = vpop.f32.mrb[41].mxu0  ;;  %v2349_v59 = vpop.f32.mrb[41].mxu1 }
 0x240   : > { %v3679_v60 = vpack.c.bf16 %v1963_v58, %v1961_v56  ;;  %v3680_v61 = vpack.c.bf16 %v2349_v59, %v2347_v57  ;;  %v1965_v62 = vpop.f32.mrb[42].mxu0  ;;  %v2351_v63 = vpop.f32.mrb[42].mxu1 }
 0x241   : > { %v1967_v0 = vpop.f32.mrb[43].mxu0  ;;  %v2353_v1 = vpop.f32.mrb[43].mxu1 }
 0x242   : > { %3217 = vst [vmem:[%s4662_s19 + $0x140] sm:$0xff] %v3679_v60  ;;  %3218 = vst [vmem:[%s4662_s19 + $0x148] sm:$0xff] %v3680_v61  ;;  %v3681_v2 = vpack.c.bf16 %v1967_v0, %v1965_v62  ;;  %v3682_v3 = vpack.c.bf16 %v2353_v1, %v2351_v63 }
 0x244   : > { %3219 = vst [vmem:[%s4662_s19 + $0x150] sm:$0xff] %v3681_v2  ;;  %3220 = vst [vmem:[%s4662_s19 + $0x158] sm:$0xff] %v3682_v3 }
 0x246   : > { %v1971_v4 = vpop.f32.mrb[44].mxu0  ;;  %v2357_v5 = vpop.f32.mrb[44].mxu1 }
 0x247   : > { %v1973_v6 = vpop.f32.mrb[45].mxu0  ;;  %v2359_v7 = vpop.f32.mrb[45].mxu1 }
 0x248   : > { %v3683_v8 = vpack.c.bf16 %v1973_v6, %v1971_v4  ;;  %v3684_v9 = vpack.c.bf16 %v2359_v7, %v2357_v5  ;;  %v1975_v10 = vpop.f32.mrb[46].mxu0  ;;  %v2361_v11 = vpop.f32.mrb[46].mxu1 }
 0x249   : > { %v1977_v12 = vpop.f32.mrb[47].mxu0  ;;  %v2363_v13 = vpop.f32.mrb[47].mxu1 }
 0x24a   : > { %3221 = vst [vmem:[%s4662_s19 + $0x160] sm:$0xff] %v3683_v8  ;;  %3222 = vst [vmem:[%s4662_s19 + $0x168] sm:$0xff] %v3684_v9  ;;  %v3685_v14 = vpack.c.bf16 %v1977_v12, %v1975_v10  ;;  %v3686_v15 = vpack.c.bf16 %v2363_v13, %v2361_v11 }
 0x24c   : > { %3223 = vst [vmem:[%s4662_s19 + $0x170] sm:$0xff] %v3685_v14  ;;  %3224 = vst [vmem:[%s4662_s19 + $0x178] sm:$0xff] %v3686_v15 }
 0x24e   : > { %v1981_v16 = vpop.f32.mrb[48].mxu0  ;;  %v2367_v17 = vpop.f32.mrb[48].mxu1 }
 0x24f   : > { %v1983_v18 = vpop.f32.mrb[49].mxu0  ;;  %v2369_v19 = vpop.f32.mrb[49].mxu1 }
 0x250   : > { %v3687_v20 = vpack.c.bf16 %v1983_v18, %v1981_v16  ;;  %v3688_v21 = vpack.c.bf16 %v2369_v19, %v2367_v17  ;;  %v1985_v22 = vpop.f32.mrb[50].mxu0  ;;  %v2371_v23 = vpop.f32.mrb[50].mxu1 }
 0x251   : > { %v1987_v24 = vpop.f32.mrb[51].mxu0  ;;  %v2373_v25 = vpop.f32.mrb[51].mxu1 }
 0x252   : > { %3225 = vst [vmem:[%s4662_s19 + $0x180] sm:$0xff] %v3687_v20  ;;  %3226 = vst [vmem:[%s4662_s19 + $0x188] sm:$0xff] %v3688_v21  ;;  %v3689_v26 = vpack.c.bf16 %v1987_v24, %v1985_v22  ;;  %v3690_v27 = vpack.c.bf16 %v2373_v25, %v2371_v23 }
 0x254   : > { %3227 = vst [vmem:[%s4662_s19 + $0x190] sm:$0xff] %v3689_v26  ;;  %3228 = vst [vmem:[%s4662_s19 + $0x198] sm:$0xff] %v3690_v27 }
 0x256   : > { %v1991_v28 = vpop.f32.mrb[52].mxu0  ;;  %v2377_v29 = vpop.f32.mrb[52].mxu1 }
 0x257   : > { %v1993_v30 = vpop.f32.mrb[53].mxu0  ;;  %v2379_v31 = vpop.f32.mrb[53].mxu1 }
 0x258   : > { %v3691_v32 = vpack.c.bf16 %v1993_v30, %v1991_v28  ;;  %v3692_v33 = vpack.c.bf16 %v2379_v31, %v2377_v29  ;;  %v1995_v34 = vpop.f32.mrb[54].mxu0  ;;  %v2381_v35 = vpop.f32.mrb[54].mxu1 }
 0x259   : > { %v1997_v36 = vpop.f32.mrb[55].mxu0  ;;  %v2383_v37 = vpop.f32.mrb[55].mxu1 }
 0x25a   : > { %3229 = vst [vmem:[%s4662_s19 + $0x1a0] sm:$0xff] %v3691_v32  ;;  %3230 = vst [vmem:[%s4662_s19 + $0x1a8] sm:$0xff] %v3692_v33  ;;  %v3693_v38 = vpack.c.bf16 %v1997_v36, %v1995_v34  ;;  %v3694_v39 = vpack.c.bf16 %v2383_v37, %v2381_v35 }
 0x25c   : > { %3231 = vst [vmem:[%s4662_s19 + $0x1b0] sm:$0xff] %v3693_v38  ;;  %3232 = vst [vmem:[%s4662_s19 + $0x1b8] sm:$0xff] %v3694_v39 }
 0x25e   : > { %v2001_v40 = vpop.f32.mrb[56].mxu0  ;;  %v2387_v41 = vpop.f32.mrb[56].mxu1 }
 0x25f   : > { %v2003_v42 = vpop.f32.mrb[57].mxu0  ;;  %v2389_v43 = vpop.f32.mrb[57].mxu1 }
 0x260   : > { %v3695_v44 = vpack.c.bf16 %v2003_v42, %v2001_v40  ;;  %v3696_v45 = vpack.c.bf16 %v2389_v43, %v2387_v41  ;;  %v2005_v46 = vpop.f32.mrb[58].mxu0  ;;  %v2391_v47 = vpop.f32.mrb[58].mxu1 }
 0x261   : > { %v2007_v48 = vpop.f32.mrb[59].mxu0  ;;  %v2393_v49 = vpop.f32.mrb[59].mxu1 }
 0x262   : > { %3233 = vst [vmem:[%s4662_s19 + $0x1c0] sm:$0xff] %v3695_v44  ;;  %3234 = vst [vmem:[%s4662_s19 + $0x1c8] sm:$0xff] %v3696_v45  ;;  %v3697_v50 = vpack.c.bf16 %v2007_v48, %v2005_v46  ;;  %v3698_v51 = vpack.c.bf16 %v2393_v49, %v2391_v47 }
 0x264   : > { %3235 = vst [vmem:[%s4662_s19 + $0x1d0] sm:$0xff] %v3697_v50  ;;  %3236 = vst [vmem:[%s4662_s19 + $0x1d8] sm:$0xff] %v3698_v51 }
 0x266   : > { %v2011_v52 = vpop.f32.mrb[60].mxu0  ;;  %v2397_v53 = vpop.f32.mrb[60].mxu1 }
 0x267   : > { %v2013_v54 = vpop.f32.mrb[61].mxu0  ;;  %v2399_v55 = vpop.f32.mrb[61].mxu1 }
 0x268   : > { %v3699_v56 = vpack.c.bf16 %v2013_v54, %v2011_v52  ;;  %v3700_v57 = vpack.c.bf16 %v2399_v55, %v2397_v53  ;;  %v2015_v58 = vpop.f32.mrb[62].mxu0  ;;  %v2401_v59 = vpop.f32.mrb[62].mxu1 }
 0x269   : > { %v2017_v60 = vpop.f32.mrb[63].mxu0  ;;  %v2403_v61 = vpop.f32.mrb[63].mxu1 }
 0x26a   : > { %3237 = vst [vmem:[%s4662_s19 + $0x1e0] sm:$0xff] %v3699_v56  ;;  %3238 = vst [vmem:[%s4662_s19 + $0x1e8] sm:$0xff] %v3700_v57  ;;  %v3701_v62 = vpack.c.bf16 %v2017_v60, %v2015_v58  ;;  %v3702_v63 = vpack.c.bf16 %v2403_v61, %v2401_v59 }
 0x26c   : > { %3239 = vst [vmem:[%s4662_s19 + $0x1f0] sm:$0xff] %v3701_v62  ;;  %3240 = vst [vmem:[%s4662_s19 + $0x1f8] sm:$0xff] %v3702_v63 }
 0x26d   : > { %4270 = shalt.err (!%p4267_p6)
}
 0x26e   : > { %s4271_s24 = scalar_lea.hbm %s4729_s6, 8192  ;;  %s4275_s26 = scalar_lea.hbm %s4785_s2, 24576 }
 0x26f   : > { %p4272_p1 = scmp.ne.s32.totalorder %s4729_s6, %s4271_s24  ;;  %p4276_p12 = scmp.lt.u32.totalorder %s4729_s6, %s4785_s2 }
 0x270   : > { %p4277_p2 = scmp.lt.u32.totalorder %s4275_s26, %s4271_s24  ;;  %p4279_p9 = scmp.lt.u32.totalorder %s4271_s24, %s4729_s6 }
 0x271   : > { %p4273_p5 = pnand %p4272_p1, %p4804_p11 }
 0x272   : > { %p4278_p8 = por %p4277_p2, %p4276_p12 }
 0x273   : > { %p4274_p7 = pneg %p4273_p5 }
 0x274   : > { %p4280_p4 = por %p4279_p9, %p4278_p8 }
 0x276   : > { %p4281_p13 = pnand %p4280_p4, %p4274_p7 }
 0x278   : > { %4284 = shalt.err (!%p4281_p13)
}
 0x279   : > { %s4351_s17 = smov 256   ;;  %s4352_s19 = smov 768  }
 0x27a   : > { %s4353_s22 = smov 16  }
 0x27b   : > { %3838 = dma.vmem_to_hbm [thread:$0]  (%p4804_p11), %s4731_s8, 8192, %s4729_s6, %s3242_s12, %s4351_s17, %s4352_s19, %s4353_s22  }
 0x27c PF: > { %p3855_p0 = scmp.ge.s32.totalorder %s4343_s14, 2  ;;  %s3273_s15 = sand.u32 1, %s4323_s9  }
 0x27d   : > { %p4805_p10 = scmp.ne.s32.totalorder %s4796_s21, 0  ;;  %s3274_s5 = scalar_lea.sflag [#allocation5], %s3273_s15 }
 0x27f   : > { %p3849_p3 = pnand %p3855_p0, %p4805_p10 }
 0x281   : > { %4318 = dma.done.wait (!%p3849_p3), %s3274_s5, 8192  }
 0x282   : > { %4320 = vsyncadd (!%p3849_p3), %s3274_s5, 4294959104  ;;  %s19_s14 = sadd.s32 1, %s4343_s14   ;;  %s4806_s9 = smov %s4327_s10 }
 0x283   : > { %p16_p6 = scmp.ge.s32.totalorder %s19_s14, 5   ;;  %s4807_s10 = smov %s4331_s11 }
 0x284   : > { %s4808_s11 = smov %s4482_s7  ;;  %s4809_s12 = smov %s4339_s13 }
 0x285   : > { %s4810_s13 = smov %s4812_s27  ;;  %18 = sbr.rel (!%p16_p6) target bundleno = 7 (0x7), region = 87 }
 0x28c   :  { %3279 = vsyncpa [#allocation4], 1 }
 0x28d   :  { %3281 = vsyncpa [#allocation4 + $0x1], 1 }
 0x28e   :  { %3282 = vsyncpa [#allocation7], 1 }
 0x28f   :  { %3284 = vsyncpa [#allocation7 + $0x1], 1 }
 0x290   :  { %3285 = vsyncpa [#allocation5], 1 }
 0x291   :  { %3287 = vsyncpa [#allocation5 + $0x1], 1 }

</bundles_post_ra>
